<compile_context>
chip_gen: v6e
topology: v6e:2x2x1
jax: 0.10.0
libtpu: 0.0.40
codegen_flags: <defaults>
</compile_context>

<pallas_src>
import math
import functools

import jax
import jax.numpy as jnp
from jax.experimental import pallas as pl
from jax.experimental.pallas import tpu as pltpu


def _round_up(a, b):
    return (a + b - 1) // b * b


def _cppn_kernel(coords_ref, z_ref,
                 wxyz_ref, w1_ref, b1_ref,
                 w5_ref, b5_ref, w6_ref, b6_ref, w7_ref, b7_ref,
                 w8_ref, b8_ref,
                 o_ref):
    bf16 = jnp.bfloat16
    f32 = jnp.float32

    coords = coords_ref[0].astype(bf16)   # (tm, 8)  columns = [x, y, r, 0...]
    z_row = z_ref[0].astype(bf16)         # (1, z_dim), one latent per image

    # U = [x y r] @ [w2; w3; w4] + z @ W1 + b1
    u = jnp.dot(coords, wxyz_ref[...], preferred_element_type=f32)          # (tm, net)
    u = u + jnp.dot(z_row, wxyz_ref.dtype.type(1) * w1_ref[...],
                    preferred_element_type=f32)                              # (1, net) bcast
    u = u + b1_ref[...]                                                      # (1, net) bcast

    h = jnp.tanh(u)
    h = jnp.tanh(jnp.dot(h.astype(bf16), w5_ref[...],
                         preferred_element_type=f32) + b5_ref[...])
    h = jnp.tanh(jnp.dot(h.astype(bf16), w6_ref[...],
                         preferred_element_type=f32) + b6_ref[...])
    h = jnp.tanh(jnp.dot(h.astype(bf16), w7_ref[...],
                         preferred_element_type=f32) + b7_ref[...])
    logits = jnp.dot(h.astype(bf16), w8_ref[...],
                     preferred_element_type=f32) + b8_ref[...]               # (tm, 128)
    o_ref[0] = jax.nn.sigmoid(logits).astype(o_ref.dtype)


def generator_forward(x, y, r, z, params, *, x_dim, y_dim, c_dim=3, tm=1024):
    """CPPN generator forward.

    x, y, r : (B, N, 1) or (B, N) pixel coordinate features, N = x_dim*y_dim.
    z       : (B, z_dim) -- one latent per image (the PyTorch code tiles the
              same latent over all pixels; we keep it un-broadcast in HBM).
    Returns NCHW (B, c_dim, x_dim, y_dim), matching transpose(1,2).view(...).
    """
    B, N = x.shape[0], x.shape[1]
    z2 = z.reshape(B, -1).astype(jnp.float32)
    z_dim = z2.shape[-1]
    net = params["w1"].shape[1]

    # ---- fold x, y, r into a single lane-padded coords matrix -------------
    cpad = 8
    coords = jnp.concatenate(
        [x.reshape(B, N, 1), y.reshape(B, N, 1), r.reshape(B, N, 1)],
        axis=-1).astype(jnp.float32)                       # (B, N, 3)
    coords = jnp.pad(coords, ((0, 0), (0, 0), (0, cpad - 3)))

    # ---- row tiling --------------------------------------------------------
    tm = max(8, min(tm, _round_up(N, 8)))
    tm = _round_up(tm, 8)
    n_pad = _round_up(N, tm)
    if n_pad != N:
        coords = jnp.pad(coords, ((0, 0), (0, n_pad - N), (0, 0)))

    z3 = z2.reshape(B, 1, z_dim)                           # (B, 1, z_dim)

    # ---- weights: stack / pad on host, bf16 for MXU inputs -----------------
    p = params
    wxyz = jnp.concatenate([p["w2"], p["w3"], p["w4"]], axis=0)    # (3, net)
    wxyz = jnp.pad(wxyz, ((0, cpad - 3), (0, 0))).astype(jnp.bfloat16)
    w1 = p["w1"].astype(jnp.bfloat16)
    w5 = p["w5"].astype(jnp.bfloat16)
    w6 = p["w6"].astype(jnp.bfloat16)
    w7 = p["w7"].astype(jnp.bfloat16)
    out_pad = _round_up(c_dim, 128)                         # lane-dense output
    w8 = jnp.pad(p["w8"], ((0, 0), (0, out_pad - c_dim))).astype(jnp.bfloat16)
    b1, b5, b6, b7 = p["b1"], p["b5"], p["b6"], p["b7"]     # f32 biases
    b8 = jnp.pad(p["b8"], ((0, 0), (0, out_pad - c_dim)))   # zero pad columns

    grid = (B, n_pad // tm)

    def full2d(a):
        return pl.BlockSpec(a.shape, lambda b, i: (0, 0))

    out_full = pl.pallas_call(
        _cppn_kernel,
        out_shape=jax.ShapeDtypeStruct((B, n_pad, out_pad), jnp.float32),
        grid_spec=pltpu.PrefetchScalarGridSpec(
            num_scalar_prefetch=0,
            grid=grid,
            in_specs=[
                pl.BlockSpec((1, tm, cpad), lambda b, i: (b, i, 0)),   # coords
                pl.BlockSpec((1, 1, z_dim), lambda b, i: (b, 0, 0)),   # z (per image)
                full2d(wxyz), full2d(w1), full2d(b1),
                full2d(w5), full2d(b5),
                full2d(w6), full2d(b6),
                full2d(w7), full2d(b7),
                full2d(w8), full2d(b8),
            ],
            out_specs=pl.BlockSpec((1, tm, out_pad), lambda b, i: (b, i, 0)),
        ),
        compiler_params=pltpu.CompilerParams(
            dimension_semantics=("parallel", "parallel")),
    )(coords, z3, wxyz, w1, b1, w5, b5, w6, b6, w7, b7, w8, b8)

    out = out_full[:, :N, :c_dim]                  # drop row + lane padding first
    out = jnp.transpose(out, (0, 2, 1))            # (B, 3, N)
    return out.reshape(B, c_dim, x_dim, y_dim)     # NCHW, like .view(-1,3,H,W)


def init_params(key, z_dim=32, net_size=128, c_dim=3):
    """nn.Linear-style init (U[-1/sqrt(in), 1/sqrt(in)]); weights stored as
    (in_features, out_features)."""
    keys = jax.random.split(key, 16)

    def lin(kw, kb, fan_in, fan_out, bias=True):
        bound = 1.0 / math.sqrt(fan_in)
        w = jax.random.uniform(kw, (fan_in, fan_out), jnp.float32, -bound, bound)
        b = (jax.random.uniform(kb, (1, fan_out), jnp.float32, -bound, bound)
             if bias else None)
        return w, b

    w1, b1 = lin(keys[0], keys[1], z_dim, net_size)
    w2, _ = lin(keys[2], keys[2], 1, net_size, bias=False)
    w3, _ = lin(keys[3], keys[3], 1, net_size, bias=False)
    w4, _ = lin(keys[4], keys[4], 1, net_size, bias=False)
    w5, b5 = lin(keys[5], keys[6], net_size, net_size)
    w6, b6 = lin(keys[7], keys[8], net_size, net_size)
    w7, b7 = lin(keys[9], keys[10], net_size, net_size)
    w8, b8 = lin(keys[11], keys[12], net_size, c_dim)
    return dict(w1=w1, b1=b1, w2=w2, w3=w3, w4=w4,
                w5=w5, b5=b5, w6=w6, b6=b6, w7=w7, b7=b7,
                w8=w8, b8=b8)


def reference_forward(x, y, r, z, p):
    """Pure-JAX f32 reference of the PyTorch module. z: (B, N, z_dim)."""
    u = (z @ p["w1"] + p["b1"] + x * p["w2"] + y * p["w3"] + r * p["w4"])
    h = jnp.tanh(u)
    h = jnp.tanh(h @ p["w5"] + p["b5"])
    h = jnp.tanh(h @ p["w6"] + p["b6"])
    h = jnp.tanh(h @ p["w7"] + p["b7"])
    return jax.nn.sigmoid(h @ p["w8"] + p["b8"])   # (B, N, 3)


if __name__ == "__main__":
    # Small shapes: batch=2, image 16x16, z_dim=32, net_size=128, c_dim=3.
    B, x_dim, y_dim, z_dim, net_size, scale = 2, 16, 16, 32, 128, 8.0
    N = x_dim * y_dim

    key = jax.random.PRNGKey(0)
    k_param, k_z = jax.random.split(key)
    params = init_params(k_param, z_dim=z_dim, net_size=net_size)

    # CPPN coordinate grids (as produced by get_coordinates in the original repo).
    xs = (jnp.arange(x_dim, dtype=jnp.float32) - (x_dim - 1) / 2.0) / ((x_dim - 1) / 2.0) * scale
    ys = (jnp.arange(y_dim, dtype=jnp.float32) - (y_dim - 1) / 2.0) / ((y_dim - 1) / 2.0) * scale
    x_mat, y_mat = jnp.meshgrid(xs, ys, indexing="ij")
    r_mat = jnp.sqrt(x_mat * x_mat + y_mat * y_mat)
    x_in = jnp.broadcast_to(x_mat.reshape(1, N, 1), (B, N, 1))
    y_in = jnp.broadcast_to(y_mat.reshape(1, N, 1), (B, N, 1))
    r_in = jnp.broadcast_to(r_mat.reshape(1, N, 1), (B, N, 1))

    # One latent per image (the original code tiles this over all pixels).
    z_vec = jax.random.normal(k_z, (B, z_dim), jnp.float32)

    fwd = jax.jit(functools.partial(generator_forward, x_dim=x_dim, y_dim=y_dim))
    out = fwd(x_in, y_in, r_in, z_vec, params)
    out = jax.block_until_ready(out)

    assert out.shape == (B, 3, x_dim, y_dim), out.shape

    # Correctness vs. pure-f32 reference (bf16 MXU inputs -> loosened tolerance).
    z_full = jnp.broadcast_to(z_vec[:, None, :], (B, N, z_dim))
    ref = reference_forward(x_in, y_in, r_in, z_full, params)          # (B, N, 3)
    ref = jnp.transpose(ref, (0, 2, 1)).reshape(B, 3, x_dim, y_dim)    # NCHW
    assert jnp.allclose(out, ref, atol=5e-2, rtol=0.0), float(jnp.max(jnp.abs(out - ref)))

    print("KERNEL_OK")
</pallas_src>

<mosaic_0001>
module attributes {stable_mosaic.version = 11 : i64} {
  func.func @_cppn_kernel(%arg0: i32, %arg1: i32, %arg2: memref<1x256x8xf32, #tpu.memory_space<vmem>>, %arg3: memref<1x1x32xf32, #tpu.memory_space<vmem>>, %arg4: memref<8x128xbf16, #tpu.memory_space<vmem>>, %arg5: memref<32x128xbf16, #tpu.memory_space<vmem>>, %arg6: memref<1x128xf32, #tpu.memory_space<vmem>>, %arg7: memref<128x128xbf16, #tpu.memory_space<vmem>>, %arg8: memref<1x128xf32, #tpu.memory_space<vmem>>, %arg9: memref<128x128xbf16, #tpu.memory_space<vmem>>, %arg10: memref<1x128xf32, #tpu.memory_space<vmem>>, %arg11: memref<128x128xbf16, #tpu.memory_space<vmem>>, %arg12: memref<1x128xf32, #tpu.memory_space<vmem>>, %arg13: memref<128x128xbf16, #tpu.memory_space<vmem>>, %arg14: memref<1x128xf32, #tpu.memory_space<vmem>>, %arg15: memref<1x256x128xf32, #tpu.memory_space<vmem>>) attributes {dimension_semantics = [#tpu.dimension_semantics<parallel>, #tpu.dimension_semantics<parallel>], iteration_bounds = array<i64: 2, 1>, scalar_prefetch = 0 : i64, scratch_operands = 0 : i64, tpu.core_type = #tpu.core_type<tc>, window_params = [{transform_indices = @transform_0, window_bounds = array<i64: 1, 256, 8>}, {transform_indices = @transform_1, window_bounds = array<i64: 1, 1, 32>}, {pipeline_mode = #tpu.pipeline_mode<synchronous>, transform_indices = @transform_2, window_bounds = array<i64: 8, 128>}, {pipeline_mode = #tpu.pipeline_mode<synchronous>, transform_indices = @transform_3, window_bounds = array<i64: 32, 128>}, {pipeline_mode = #tpu.pipeline_mode<synchronous>, transform_indices = @transform_4, window_bounds = array<i64: 1, 128>}, {pipeline_mode = #tpu.pipeline_mode<synchronous>, transform_indices = @transform_5, window_bounds = array<i64: 128, 128>}, {pipeline_mode = #tpu.pipeline_mode<synchronous>, transform_indices = @transform_6, window_bounds = array<i64: 1, 128>}, {pipeline_mode = #tpu.pipeline_mode<synchronous>, transform_indices = @transform_7, window_bounds = array<i64: 128, 128>}, {pipeline_mode = #tpu.pipeline_mode<synchronous>, transform_indices = @transform_8, window_bounds = array<i64: 1, 128>}, {pipeline_mode = #tpu.pipeline_mode<synchronous>, transform_indices = @transform_9, window_bounds = array<i64: 128, 128>}, {pipeline_mode = #tpu.pipeline_mode<synchronous>, transform_indices = @transform_10, window_bounds = array<i64: 1, 128>}, {pipeline_mode = #tpu.pipeline_mode<synchronous>, transform_indices = @transform_11, window_bounds = array<i64: 128, 128>}, {pipeline_mode = #tpu.pipeline_mode<synchronous>, transform_indices = @transform_12, window_bounds = array<i64: 1, 128>}, {transform_indices = @transform_13, window_bounds = array<i64: 1, 256, 128>}]} {
    %c0 = arith.constant 0 : index
    %c0_0 = arith.constant 0 : index
    %c0_1 = arith.constant 0 : index
    %0 = vector.load %arg2[%c0, %c0_0, %c0_1] : memref<1x256x8xf32, #tpu.memory_space<vmem>>, vector<1x256x8xf32>
    %1 = vector.shape_cast %0 : vector<1x256x8xf32> to vector<256x8xf32>
    %2 = arith.truncf %1 : vector<256x8xf32> to vector<256x8xbf16>
    %c0_2 = arith.constant 0 : index
    %c0_3 = arith.constant 0 : index
    %c0_4 = arith.constant 0 : index
    %3 = vector.load %arg3[%c0_2, %c0_3, %c0_4] : memref<1x1x32xf32, #tpu.memory_space<vmem>>, vector<1x1x32xf32>
    %4 = vector.shape_cast %3 : vector<1x1x32xf32> to vector<1x32xf32>
    %5 = arith.truncf %4 : vector<1x32xf32> to vector<1x32xbf16>
    %c0_5 = arith.constant 0 : index
    %c0_6 = arith.constant 0 : index
    %6 = vector.load %arg4[%c0_5, %c0_6] : memref<8x128xbf16, #tpu.memory_space<vmem>>, vector<8x128xbf16>
    %cst = arith.constant dense<0.000000e+00> : vector<256x128xf32>
    %7 = tpu.matmul %2, %6, %cst {dimension_numbers = #tpu.dot_dimension_numbers<[1], [0], [0], [1], [0, 0, 1, 1], [], []>} : vector<256x8xbf16>, vector<8x128xbf16>, vector<256x128xf32> -> vector<256x128xf32>
    %c0_7 = arith.constant 0 : index
    %c0_8 = arith.constant 0 : index
    %8 = vector.load %arg5[%c0_7, %c0_8] : memref<32x128xbf16, #tpu.memory_space<vmem>>, vector<32x128xbf16>
    %cst_9 = arith.constant 1.000000e+00 : bf16
    %9 = vector.broadcast %cst_9 : bf16 to vector<32x128xbf16>
    %10 = arith.mulf %9, %8 : vector<32x128xbf16>
    %cst_10 = arith.constant dense<0.000000e+00> : vector<1x128xf32>
    %11 = tpu.matmul %5, %10, %cst_10 {dimension_numbers = #tpu.dot_dimension_numbers<[1], [0], [0], [1], [0, 0, 1, 1], [], []>} : vector<1x32xbf16>, vector<32x128xbf16>, vector<1x128xf32> -> vector<1x128xf32>
    %12 = vector.broadcast %11 : vector<1x128xf32> to vector<256x128xf32>
    %13 = arith.addf %7, %12 : vector<256x128xf32>
    %c0_11 = arith.constant 0 : index
    %c0_12 = arith.constant 0 : index
    %14 = vector.load %arg6[%c0_11, %c0_12] : memref<1x128xf32, #tpu.memory_space<vmem>>, vector<1x128xf32>
    %15 = vector.broadcast %14 : vector<1x128xf32> to vector<256x128xf32>
    %16 = arith.addf %13, %15 : vector<256x128xf32>
    %17 = math.tanh %16 : vector<256x128xf32>
    %18 = arith.truncf %17 : vector<256x128xf32> to vector<256x128xbf16>
    %c0_13 = arith.constant 0 : index
    %c0_14 = arith.constant 0 : index
    %19 = vector.load %arg7[%c0_13, %c0_14] : memref<128x128xbf16, #tpu.memory_space<vmem>>, vector<128x128xbf16>
    %cst_15 = arith.constant dense<0.000000e+00> : vector<256x128xf32>
    %20 = tpu.matmul %18, %19, %cst_15 {dimension_numbers = #tpu.dot_dimension_numbers<[1], [0], [0], [1], [0, 0, 1, 1], [], []>} : vector<256x128xbf16>, vector<128x128xbf16>, vector<256x128xf32> -> vector<256x128xf32>
    %c0_16 = arith.constant 0 : index
    %c0_17 = arith.constant 0 : index
    %21 = vector.load %arg8[%c0_16, %c0_17] : memref<1x128xf32, #tpu.memory_space<vmem>>, vector<1x128xf32>
    %22 = vector.broadcast %21 : vector<1x128xf32> to vector<256x128xf32>
    %23 = arith.addf %20, %22 : vector<256x128xf32>
    %24 = math.tanh %23 : vector<256x128xf32>
    %25 = arith.truncf %24 : vector<256x128xf32> to vector<256x128xbf16>
    %c0_18 = arith.constant 0 : index
    %c0_19 = arith.constant 0 : index
    %26 = vector.load %arg9[%c0_18, %c0_19] : memref<128x128xbf16, #tpu.memory_space<vmem>>, vector<128x128xbf16>
    %cst_20 = arith.constant dense<0.000000e+00> : vector<256x128xf32>
    %27 = tpu.matmul %25, %26, %cst_20 {dimension_numbers = #tpu.dot_dimension_numbers<[1], [0], [0], [1], [0, 0, 1, 1], [], []>} : vector<256x128xbf16>, vector<128x128xbf16>, vector<256x128xf32> -> vector<256x128xf32>
    %c0_21 = arith.constant 0 : index
    %c0_22 = arith.constant 0 : index
    %28 = vector.load %arg10[%c0_21, %c0_22] : memref<1x128xf32, #tpu.memory_space<vmem>>, vector<1x128xf32>
    %29 = vector.broadcast %28 : vector<1x128xf32> to vector<256x128xf32>
    %30 = arith.addf %27, %29 : vector<256x128xf32>
    %31 = math.tanh %30 : vector<256x128xf32>
    %32 = arith.truncf %31 : vector<256x128xf32> to vector<256x128xbf16>
    %c0_23 = arith.constant 0 : index
    %c0_24 = arith.constant 0 : index
    %33 = vector.load %arg11[%c0_23, %c0_24] : memref<128x128xbf16, #tpu.memory_space<vmem>>, vector<128x128xbf16>
    %cst_25 = arith.constant dense<0.000000e+00> : vector<256x128xf32>
    %34 = tpu.matmul %32, %33, %cst_25 {dimension_numbers = #tpu.dot_dimension_numbers<[1], [0], [0], [1], [0, 0, 1, 1], [], []>} : vector<256x128xbf16>, vector<128x128xbf16>, vector<256x128xf32> -> vector<256x128xf32>
    %c0_26 = arith.constant 0 : index
    %c0_27 = arith.constant 0 : index
    %35 = vector.load %arg12[%c0_26, %c0_27] : memref<1x128xf32, #tpu.memory_space<vmem>>, vector<1x128xf32>
    %36 = vector.broadcast %35 : vector<1x128xf32> to vector<256x128xf32>
    %37 = arith.addf %34, %36 : vector<256x128xf32>
    %38 = math.tanh %37 : vector<256x128xf32>
    %39 = arith.truncf %38 : vector<256x128xf32> to vector<256x128xbf16>
    %c0_28 = arith.constant 0 : index
    %c0_29 = arith.constant 0 : index
    %40 = vector.load %arg13[%c0_28, %c0_29] : memref<128x128xbf16, #tpu.memory_space<vmem>>, vector<128x128xbf16>
    %cst_30 = arith.constant dense<0.000000e+00> : vector<256x128xf32>
    %41 = tpu.matmul %39, %40, %cst_30 {dimension_numbers = #tpu.dot_dimension_numbers<[1], [0], [0], [1], [0, 0, 1, 1], [], []>} : vector<256x128xbf16>, vector<128x128xbf16>, vector<256x128xf32> -> vector<256x128xf32>
    %c0_31 = arith.constant 0 : index
    %c0_32 = arith.constant 0 : index
    %42 = vector.load %arg14[%c0_31, %c0_32] : memref<1x128xf32, #tpu.memory_space<vmem>>, vector<1x128xf32>
    %43 = vector.broadcast %42 : vector<1x128xf32> to vector<256x128xf32>
    %44 = arith.addf %41, %43 : vector<256x128xf32>
    %45 = arith.negf %44 : vector<256x128xf32>
    %46 = math.exp %45 : vector<256x128xf32>
    %cst_33 = arith.constant 1.000000e+00 : f32
    %47 = vector.broadcast %cst_33 : f32 to vector<256x128xf32>
    %48 = arith.addf %47, %46 : vector<256x128xf32>
    %49 = arith.divf %47, %48 : vector<256x128xf32>
    %c0_34 = arith.constant 0 : index
    %c0_35 = arith.constant 0 : index
    %c0_36 = arith.constant 0 : index
    %50 = vector.load %arg15[%c0_34, %c0_35, %c0_36] : memref<1x256x128xf32, #tpu.memory_space<vmem>>, vector<1x256x128xf32>
    %51 = vector.shape_cast %50 : vector<1x256x128xf32> to vector<256x128xf32>
    %52 = vector.shape_cast %49 : vector<256x128xf32> to vector<1x256x128xf32>
    tpu.vector_store %arg15[%c0_34, %c0_35, %c0_36], %52 {strides = array<i32>} : memref<1x256x128xf32, #tpu.memory_space<vmem>>, vector<1x256x128xf32>,
    return
  }
  func.func @transform_0(%arg0: i32, %arg1: i32) -> (i32, i32, i32) {
    %c0_i32 = arith.constant 0 : i32
    %c0_i32_0 = arith.constant 0 : i32
    return %arg0, %arg1, %c0_i32 : i32, i32, i32
  }
  func.func @transform_1(%arg0: i32, %arg1: i32) -> (i32, i32, i32) {
    %c0_i32 = arith.constant 0 : i32
    %c0_i32_0 = arith.constant 0 : i32
    %c0_i32_1 = arith.constant 0 : i32
    return %arg0, %c0_i32, %c0_i32_0 : i32, i32, i32
  }
  func.func @transform_2(%arg0: i32, %arg1: i32) -> (i32, i32) {
    %c0_i32 = arith.constant 0 : i32
    %c0_i32_0 = arith.constant 0 : i32
    %c0_i32_1 = arith.constant 0 : i32
    return %c0_i32, %c0_i32_0 : i32, i32
  }
  func.func @transform_3(%arg0: i32, %arg1: i32) -> (i32, i32) {
    %c0_i32 = arith.constant 0 : i32
    %c0_i32_0 = arith.constant 0 : i32
    %c0_i32_1 = arith.constant 0 : i32
    return %c0_i32, %c0_i32_0 : i32, i32
  }
  func.func @transform_4(%arg0: i32, %arg1: i32) -> (i32, i32) {
    %c0_i32 = arith.constant 0 : i32
    %c0_i32_0 = arith.constant 0 : i32
    %c0_i32_1 = arith.constant 0 : i32
    return %c0_i32, %c0_i32_0 : i32, i32
  }
  func.func @transform_5(%arg0: i32, %arg1: i32) -> (i32, i32) {
    %c0_i32 = arith.constant 0 : i32
    %c0_i32_0 = arith.constant 0 : i32
    %c0_i32_1 = arith.constant 0 : i32
    return %c0_i32, %c0_i32_0 : i32, i32
  }
  func.func @transform_6(%arg0: i32, %arg1: i32) -> (i32, i32) {
    %c0_i32 = arith.constant 0 : i32
    %c0_i32_0 = arith.constant 0 : i32
    %c0_i32_1 = arith.constant 0 : i32
    return %c0_i32, %c0_i32_0 : i32, i32
  }
  func.func @transform_7(%arg0: i32, %arg1: i32) -> (i32, i32) {
    %c0_i32 = arith.constant 0 : i32
    %c0_i32_0 = arith.constant 0 : i32
    %c0_i32_1 = arith.constant 0 : i32
    return %c0_i32, %c0_i32_0 : i32, i32
  }
  func.func @transform_8(%arg0: i32, %arg1: i32) -> (i32, i32) {
    %c0_i32 = arith.constant 0 : i32
    %c0_i32_0 = arith.constant 0 : i32
    %c0_i32_1 = arith.constant 0 : i32
    return %c0_i32, %c0_i32_0 : i32, i32
  }
  func.func @transform_9(%arg0: i32, %arg1: i32) -> (i32, i32) {
    %c0_i32 = arith.constant 0 : i32
    %c0_i32_0 = arith.constant 0 : i32
    %c0_i32_1 = arith.constant 0 : i32
    return %c0_i32, %c0_i32_0 : i32, i32
  }
  func.func @transform_10(%arg0: i32, %arg1: i32) -> (i32, i32) {
    %c0_i32 = arith.constant 0 : i32
    %c0_i32_0 = arith.constant 0 : i32
    %c0_i32_1 = arith.constant 0 : i32
    return %c0_i32, %c0_i32_0 : i32, i32
  }
  func.func @transform_11(%arg0: i32, %arg1: i32) -> (i32, i32) {
    %c0_i32 = arith.constant 0 : i32
    %c0_i32_0 = arith.constant 0 : i32
    %c0_i32_1 = arith.constant 0 : i32
    return %c0_i32, %c0_i32_0 : i32, i32
  }
  func.func @transform_12(%arg0: i32, %arg1: i32) -> (i32, i32) {
    %c0_i32 = arith.constant 0 : i32
    %c0_i32_0 = arith.constant 0 : i32
    %c0_i32_1 = arith.constant 0 : i32
    return %c0_i32, %c0_i32_0 : i32, i32
  }
  func.func @transform_13(%arg0: i32, %arg1: i32) -> (i32, i32, i32) {
    %c0_i32 = arith.constant 0 : i32
    %c0_i32_0 = arith.constant 0 : i32
    return %arg0, %arg1, %c0_i32 : i32, i32, i32
  }
}

</mosaic_0001>

<bundles_post_ra>
// kernel: generator_forward.1
= control target key start
LH: loop header
LB: loop body
LE: loop exit
PB: predicated region body
PF: predicated region fallthrough
CT: control target
= control target key end

     0   :  { %s3298_s25 = smov 0   ;;  %s3300_s26 = smov 0   ;;  %s3786_s0 = inlined_call_operand.vmem [shape: f32[2,256,8], index: 0, kind: input, shape index: {}]   ;;  %s3787_s1 = inlined_call_operand.vmem [shape: f32[2,1,32], index: 1, kind: input, shape index: {}]   ;;  %s3788_s2 = inlined_call_operand.vmem [shape: bf16[8,128], index: 2, kind: input, shape index: {}]   ;;  %s3789_s3 = inlined_call_operand.vmem [shape: bf16[32,128], index: 3, kind: input, shape index: {}]   ;;  %s3790_s4 = inlined_call_operand.vmem [shape: f32[1,128], index: 4, kind: input, shape index: {}]   ;;  %s3791_s5 = inlined_call_operand.vmem [shape: bf16[128,128], index: 5, kind: input, shape index: {}]   ;;  %s3792_s6 = inlined_call_operand.vmem [shape: f32[1,128], index: 6, kind: input, shape index: {}]   ;;  %s3793_s7 = inlined_call_operand.vmem [shape: bf16[128,128], index: 7, kind: input, shape index: {}]   ;;  %s3794_s8 = inlined_call_operand.vmem [shape: f32[1,128], index: 8, kind: input, shape index: {}]   ;;  %s3795_s9 = inlined_call_operand.vmem [shape: bf16[128,128], index: 9, kind: input, shape index: {}]   ;;  %s3796_s10 = inlined_call_operand.vmem [shape: f32[1,128], index: 10, kind: input, shape index: {}]   ;;  %s3797_s11 = inlined_call_operand.vmem [shape: bf16[128,128], index: 11, kind: input, shape index: {}]   ;;  %s3798_s12 = inlined_call_operand.vmem [shape: f32[1,128], index: 12, kind: input, shape index: {}]   ;;  %s3799_s13 = inlined_call_operand.vmem [shape: f32[2,256,128], index: 13, kind: output, shape index: {}]  }
   0x1   :  { %s3302_s27 = smov 0  }
   0x2 LB: > { %s35_s28 = sadd.s32 1, %s3220_s26  ;;  %p2307_p0 = scmp.ge.s32.totalorder %s3224_s27, 1  ;;  %s3224_s27 = sphi %s3302_s27, %s23_s27   ;;  %s3220_s26 = sphi %s3300_s26, %s3801_s26   ;;  %s3216_s25 = sphi %s3298_s25, %s3800_s25  }
   0x3   : > { %p37_p1 = scmp.ge.s32.totalorder %s35_s28, 2  ;;  %p416_p2 = scmp.lt.s32.totalorder %s3224_s27, 3 }
   0x5   : > { %s3803_s28 = smov (%p37_p1, %s35_s28), 0  ;;  %p417_p3 = pnand %p2307_p0, %p416_p2 }
   0x6   : > { %p472_p4 = scmp.lt.s32.totalorder (!%p417_p3), %s3216_s25, 1 }
   0x7   : > { %420 = sbr.rel (%p417_p3) target bundleno = 1195 (0x4ab), region = 72 }
   0xc   : > { %v2784_v0 = vld [vmem:[%s3789_s3 + $0x8] sm:$0xff]   ;;  %v3226_v1 = vmov 0.0   ;;  %v545_v2 = vld [vmem:[%s3788_s2] sm:$0xf]  ;;  %vm659_vm0 = vcmask 1043456   ;;  %vm3227_vm1 = vmmov 0  }
   0xd   : > { %2520 = vmatprep.subr.bf16.mxu0 %v3226_v1  ;;  %2757 = vmatprep.subr.msk.bf16.mxu1 %vm659_vm0, %v545_v2  ;;  %v2785_v3 = vld [vmem:[%s3789_s3] sm:$0xff]   ;;  %v661_v4 = vsel %vm659_vm0, %v545_v2, 0  ;;  %s3805_s25 = smov (!%p472_p4, %s3216_s25), 1  ;;  %vm562_vm2 = vcmask 261120   ;;  %vm610_vm3 = vcmask 64512   ;;  %v2786_v55 = vld [vmem:[%s3791_s5 + $0x38] sm:$0xff]  }
   0xe   : > { %2521 = vmatpush3.bf16.msra.mxu0 %v2784_v0  ;;  %2755 = vmatpush3.bf16.msra.mxu1 %v661_v4  ;;  %s2402_s18 = sshll.u32 %s3805_s25, 8  ;;  %s483_s21 = scalar_lea.vmem %s3787_s1, %s3805_s25  ;;  %v2787_v56 = vld [vmem:[%s3791_s5 + $0x30] sm:$0xff]   ;;  %v2788_v57 = vld [vmem:[%s3791_s5 + $0x28] sm:$0xff]   ;;  %v2789_v58 = vld [vmem:[%s3791_s5 + $0x20] sm:$0xff]  }
   0xf   : > { %2522 = vmatprep.subr.bf16.mxu0 %v3226_v1  ;;  %2524 = vmatprep.mubr.msk.bf16.mxu0 %vm3227_vm1, %v3226_v1  ;;  %s3339_s24 = scalar_lea.vmem %s3786_s0, %s2402_s18  ;;  %v543_v5 = vld [vmem:[%s483_s21] sm:$0x1]  ;;  %v2790_v59 = vld [vmem:[%s3791_s5 + $0x18] sm:$0xff]   ;;  %v2791_v60 = vld [vmem:[%s3791_s5 + $0x10] sm:$0xff]   ;;  %v606_v1 = vlaneseq  ;;  %s3727_s16 = scalar_lea.vmem %s3799_s13, %s2402_s18 }
  0x10   : > { %v511_v6 = vld [vmem:[%s3339_s24 + $0x80] sm:$0xff]  ;;  %v512_v7 = vld [vmem:[%s3339_s24 + $0x88] sm:$0xff]  ;;  %v544_v8 = vpack.c.bf16 %v543_v5, %v543_v5  ;;  %v513_v9 = vld [vmem:[%s3339_s24 + $0x90] sm:$0xff] }
  0x11   : > { %v535_v10 = vpack.c.bf16 %v512_v7, %v511_v6  ;;  %v514_v11 = vld [vmem:[%s3339_s24 + $0x98] sm:$0xff]  ;;  %v495_v12 = vld [vmem:[%s3339_s24] sm:$0xff]  ;;  %v496_v13 = vld [vmem:[%s3339_s24 + $0x8] sm:$0xff] }
  0x12   : > { %2523 = vmatpush3.bf16.msra.mxu0 %v2785_v3  ;;  %v536_v14 = vpack.c.bf16 %v514_v11, %v513_v9  ;;  %v527_v15 = vpack.c.bf16 %v496_v13, %v495_v12  ;;  %v515_v16 = vld [vmem:[%s3339_s24 + $0xa0] sm:$0xff]  ;;  %v516_v17 = vld [vmem:[%s3339_s24 + $0xa8] sm:$0xff]  ;;  %v497_v19 = vld [vmem:[%s3339_s24 + $0x10] sm:$0xff]  ;;  %v607_v3 = vshrl.u32 %v606_v1, 7 }
  0x13   : > { %2756 = vmatprep.subr.msk.bf16.mxu0 %vm659_vm0, %v545_v2  ;;  %2546 = vmatprep.mubr.msk.bf16.mxu1 %vm610_vm3, %v535_v10  ;;  %v537_v18 = vpack.c.bf16 %v516_v17, %v515_v16  ;;  %v498_v20 = vld [vmem:[%s3339_s24 + $0x18] sm:$0xff]  ;;  %v499_v21 = vld [vmem:[%s3339_s24 + $0x20] sm:$0xff]  ;;  %v500_v22 = vld [vmem:[%s3339_s24 + $0x28] sm:$0xff] }
  0x14   : > { %2547 = vmatmul.mubr.msk.bf16.vlgmr.msra.gmra.mxu1 %vm610_vm3, %v536_v14  ;;  %v517_v23 = vld [vmem:[%s3339_s24 + $0xb0] sm:$0xff]  ;;  %v518_v24 = vld [vmem:[%s3339_s24 + $0xb8] sm:$0xff]  ;;  %v528_v25 = vpack.c.bf16 %v498_v20, %v497_v19  ;;  %v519_v26 = vld [vmem:[%s3339_s24 + $0xc0] sm:$0xff]  ;;  %v529_v28 = vpack.c.bf16 %v500_v22, %v499_v21 }
  0x15   : > { %2525 = vmatmul.mubr.msk.bf16.vlgmr.msra.gmra.mxu0 %vm562_vm2, %v544_v8  ;;  %2550 = vmatprep.mubr.msk.bf16.mxu1 %vm610_vm3, %v537_v18  ;;  %v520_v27 = vld [vmem:[%s3339_s24 + $0xc8] sm:$0xff]  ;;  %v538_v29 = vpack.c.bf16 %v518_v24, %v517_v23  ;;  %v501_v31 = vld [vmem:[%s3339_s24 + $0x30] sm:$0xff]  ;;  %v502_v32 = vld [vmem:[%s3339_s24 + $0x38] sm:$0xff]  ;;  %v608_v8 = vsub.s32 0, %v607_v3 }
  0x16   : > { %2529 = vmatpush3.bf16.msra.mxu0 %v661_v4  ;;  %2530 = vmatprep.mubr.msk.bf16.mxu0 %vm610_vm3, %v527_v15  ;;  %v539_v30 = vpack.c.bf16 %v520_v27, %v519_v26  ;;  %v503_v33 = vld [vmem:[%s3339_s24 + $0x40] sm:$0xff]  ;;  %v504_v34 = vld [vmem:[%s3339_s24 + $0x48] sm:$0xff]  ;;  %v521_v35 = vld [vmem:[%s3339_s24 + $0xd0] sm:$0xff]  ;;  %v530_v39 = vpack.c.bf16 %v502_v32, %v501_v31 }
  0x17   : > { %v522_v36 = vld [vmem:[%s3339_s24 + $0xd8] sm:$0xff]  ;;  %v523_v37 = vld [vmem:[%s3339_s24 + $0xe0] sm:$0xff]  ;;  %v524_v38 = vld [vmem:[%s3339_s24 + $0xe8] sm:$0xff]  ;;  %v531_v40 = vpack.c.bf16 %v504_v34, %v503_v33  ;;  %2562 = vmatprep.subr.bf16.mxu0 %v2786_v55 }
  0x18   : > { %v540_v41 = vpack.c.bf16 %v522_v36, %v521_v35  ;;  %v541_v42 = vpack.c.bf16 %v524_v38, %v523_v37  ;;  %v505_v43 = vld [vmem:[%s3339_s24 + $0x50] sm:$0xff]  ;;  %v506_v44 = vld [vmem:[%s3339_s24 + $0x58] sm:$0xff]  ;;  %v507_v45 = vld [vmem:[%s3339_s24 + $0x60] sm:$0xff] }
  0x19   : > { %v508_v46 = vld [vmem:[%s3339_s24 + $0x68] sm:$0xff]  ;;  %v525_v47 = vld [vmem:[%s3339_s24 + $0xf0] sm:$0xff]  ;;  %v526_v48 = vld [vmem:[%s3339_s24 + $0xf8] sm:$0xff]  ;;  %v532_v49 = vpack.c.bf16 %v506_v44, %v505_v43 }
  0x1a   : > { %v533_v50 = vpack.c.bf16 %v508_v46, %v507_v45  ;;  %v542_v51 = vpack.c.bf16 %v526_v48, %v525_v47  ;;  %v509_v52 = vld [vmem:[%s3339_s24 + $0x70] sm:$0xff]  ;;  %v510_v53 = vld [vmem:[%s3339_s24 + $0x78] sm:$0xff]  ;;  %v2792_v61 = vld [vmem:[%s3791_s5 + $0x8] sm:$0xff]  }
  0x1b   : > { %v534_v54 = vpack.c.bf16 %v510_v53, %v509_v52  ;;  %v2793_v62 = vld [vmem:[%s3791_s5] sm:$0xff]   ;;  %v2794_v63 = vld [vmem:[%s3793_s7 + $0x38] sm:$0xff]   ;;  %v2795_v0 = vld [vmem:[%s3793_s7 + $0x30] sm:$0xff]  }
  0x1c   : > { %2551 = vmatmul.mubr.msk.bf16.gmra.mxu1 %vm610_vm3, %v538_v29  ;;  %2610 = vmatprep.subr.bf16.mxu1 %v2794_v63  ;;  %v3434_v17 = vld [vmem:[%s3790_s4] ss:$0 sm:$0xff] }
  0x1d   : > { %2531 = vmatmul.mubr.msk.bf16.vlgmr.msra.gmra.mxu0 %vm610_vm3, %v528_v25  ;;  %2554 = vmatprep.mubr.msk.bf16.mxu1 %vm610_vm3, %v539_v30 }
  0x1e   : > { %2534 = vmatprep.mubr.msk.bf16.mxu0 %vm610_vm3, %v529_v28  ;;  %2563 = vmatpush3.bf16.msra.mxu0 %v2786_v55 }
  0x1f   : > { %2564 = vmatprep.subr.bf16.mxu0 %v2787_v56  ;;  %2611 = vmatpush3.bf16.msra.mxu1 %v2794_v63 }
  0x20   : > { %2612 = vmatprep.subr.bf16.mxu1 %v2795_v0 }
  0x22   : > { %2565 = vmatpush3.bf16.msra.mxu0 %v2787_v56 }
  0x23   : > { %2566 = vmatprep.subr.bf16.mxu0 %v2788_v57  ;;  %2613 = vmatpush3.bf16.msra.mxu1 %v2795_v0 }
  0x24   : > { %2555 = vmatmul.mubr.msk.bf16.gmra.mxu1 %vm610_vm3, %v540_v41 }
  0x25   : > { %2535 = vmatmul.mubr.msk.bf16.gmra.mxu0 %vm610_vm3, %v530_v39  ;;  %2558 = vmatprep.mubr.msk.bf16.mxu1 %vm610_vm3, %v541_v42 }
  0x26   : > { %2538 = vmatprep.mubr.msk.bf16.mxu0 %vm610_vm3, %v531_v40  ;;  %2567 = vmatpush3.bf16.msra.mxu0 %v2788_v57 }
  0x27   : > { %2568 = vmatprep.subr.bf16.mxu0 %v2789_v58 }
  0x2a   : > { %2569 = vmatpush3.bf16.msra.mxu0 %v2789_v58 }
  0x2b   : > { %2570 = vmatprep.subr.bf16.mxu0 %v2790_v59 }
  0x2c   : > { %2559 = vmatmul.mubr.msk.bf16.gmra.mxu1 %vm610_vm3, %v542_v51 }
  0x2d   : > { %2539 = vmatmul.mubr.msk.bf16.gmra.mxu0 %vm610_vm3, %v532_v49 }
  0x2e   : > { %2542 = vmatprep.mubr.msk.bf16.mxu0 %vm610_vm3, %v533_v50  ;;  %2571 = vmatpush3.bf16.msra.mxu0 %v2790_v59 }
  0x2f   : > { %2572 = vmatprep.subr.bf16.mxu0 %v2791_v60 }
  0x32   : > { %2573 = vmatpush3.bf16.msra.mxu0 %v2791_v60 }
  0x33   : > { %2574 = vmatprep.subr.bf16.mxu0 %v2792_v61 }
  0x35   : > { %2543 = vmatmul.mubr.msk.bf16.gmra.mxu0 %vm610_vm3, %v534_v54 }
  0x36   : > { %2575 = vmatpush3.bf16.msra.mxu0 %v2792_v61 }
  0x37   : > { %2576 = vmatprep.subr.bf16.mxu0 %v2793_v62 }
  0x3a   : > { %2577 = vmatpush3.bf16.msra.mxu0 %v2793_v62 }
  0xd4   : > { %v3420_v4 = vpop.f32.mrf.mxu1 }
  0xd5   : > { %v600_v2 = vpop.f32.mrf.mxu0 }
  0xd6   : > { %v3422_v6 = vpop.f32.mrf.mxu1  ;;  %v3428_v13 = vrot.slane %v600_v2, %v608_v8 }
  0xd7   : > { %v2526_v5 = vpop.f32.mrf.mxu0 }
  0xd8   : > { %v3424_v9 = vpop.f32.mrf.mxu1 }
  0xd9   : > { %v603_v7 = vpop.f32.mrf.mxu0 }
  0xda   : > { %v3426_v12 = vpop.f32.mrf.mxu1 }
  0xdb   : > { %v2527_v10 = vpop.f32.mrf.mxu0  ;;  %v765_v1 = vadd.f32 %v3426_v12, %v3428_v13 }
  0xdc   : > { %v3437_v19 = vpop.f32.mrf.mxu1  ;;  %v762_v10 = vadd.f32 %v3422_v6, %v3428_v13 }
  0xdd   : > { %v2532_v11 = vpop.f32.mrf.mxu0 }
  0xde   : > { %v706_v18 = vadd.f32 %v2532_v11, %v3428_v13  ;;  %v3444_v27 = vpop.f32.mrf.mxu1 }
  0xdf   : > { %v697_v14 = vpop.f32.mrf.mxu0 }
  0xe0   : > { %v698_v15 = vadd.f32 %v697_v14, %v3428_v13  ;;  %v833_v26 = vadd.f32 %v3434_v17, %v706_v18  ;;  %v3448_v32 = vpop.f32.mrf.mxu1  ;;  %v848_v18 = vadd.f32 %v3434_v17, %v765_v1 }
  0xe1   : > { %v2533_v16 = vpop.f32.mrf.mxu0 }
  0xe2   : > { %v709_v20 = vadd.f32 %v2533_v16, %v3428_v13  ;;  %v831_v21 = vadd.f32 %v3434_v17, %v698_v15  ;;  %v780_v40 = vpop.f32.mrf.mxu1 }
  0xe3   : > { %v700_v22 = vpop.f32.mrf.mxu0 }
  0xe4   : > { %v834_v23 = vadd.f32 %v3434_v17, %v709_v20  ;;  %v701_v24 = vadd.f32 %v700_v22, %v3428_v13  ;;  %2818 = vtanh.f32 %v831_v21  ;;  %v3458_v46 = vpop.f32.mrf.mxu1 }
  0xe5   : > { %v2536_v25 = vpop.f32.mrf.mxu0 }
  0xe6   : > { %v832_v28 = vadd.f32 %v3434_v17, %v701_v24  ;;  %2820 = vtanh.f32 %v834_v23  ;;  %v722_v33 = vadd.f32 %v2536_v25, %v3428_v13  ;;  %v3465_v57 = vpop.f32.mrf.mxu1  ;;  %v847_v25 = vadd.f32 %v3434_v17, %v762_v10 }
  0xe7   : > { %v713_v29 = vpop.f32.mrf.mxu0 }
  0xe8   : > { %2822 = vtanh.f32 %v832_v28  ;;  %v714_v30 = vadd.f32 %v713_v29, %v3428_v13  ;;  %v837_v41 = vadd.f32 %v3434_v17, %v722_v33  ;;  %v3472_v3 = vpop.f32.mrf.mxu1  ;;  %v781_v29 = vadd.f32 %v780_v40, %v3428_v13 }
  0xe9   : > { %v2537_v31 = vpop.f32.mrf.mxu0  ;;  %2824 = vtanh.f32 %v833_v26  ;;  %v773_v26 = vadd.f32 %v3424_v9, %v3428_v13  ;;  %v778_v33 = vadd.f32 %v3444_v27, %v3428_v13 }
  0xea   : > { %v725_v34 = vadd.f32 %v2537_v31, %v3428_v13  ;;  %v835_v35 = vadd.f32 %v3434_v17, %v714_v30  ;;  %v796_v21 = vpop.f32.mrf.mxu1  ;;  %v770_v30 = vadd.f32 %v3420_v4, %v3428_v13 }
  0xeb   : > { %v716_v36 = vpop.f32.mrf.mxu0  ;;  %v850_v9 = vadd.f32 %v3434_v17, %v773_v26  ;;  %v851_v4 = vadd.f32 %v3434_v17, %v778_v33  ;;  %v797_v27 = vadd.f32 %v796_v21, %v3428_v13 }
  0xec   : > { %v838_v37 = vadd.f32 %v3434_v17, %v725_v34  ;;  %v717_v38 = vadd.f32 %v716_v36, %v3428_v13  ;;  %2826 = vtanh.f32 %v835_v35  ;;  %v3490_v31 = vpop.f32.mrf.mxu1  ;;  %v852_v36 = vadd.f32 %v3434_v17, %v781_v29 }
  0xed   : > { %v2540_v39 = vpop.f32.mrf.mxu0 }
  0xee   : > { %v836_v42 = vadd.f32 %v3434_v17, %v717_v38  ;;  %2828 = vtanh.f32 %v838_v37  ;;  %v738_v47 = vadd.f32 %v2540_v39, %v3428_v13  ;;  %v849_v38 = vadd.f32 %v3434_v17, %v770_v30  ;;  %v809_v39 = vpop.f32.mrf.mxu1 }
  0xef   : > { %v729_v43 = vpop.f32.mrf.mxu0 }
  0xf0   : > { %2830 = vtanh.f32 %v836_v42  ;;  %v730_v44 = vadd.f32 %v729_v43, %v3428_v13  ;;  %v841_v58 = vadd.f32 %v3434_v17, %v738_v47  ;;  %v789_v42 = vadd.f32 %v3448_v32, %v3428_v13 }
  0xf1   : > { %v2541_v45 = vpop.f32.mrf.mxu0  ;;  %2832 = vtanh.f32 %v837_v41  ;;  %v2819_v51 = vpop.eup %2818 }
  0xf2   : > { %v741_v48 = vadd.f32 %v2541_v45, %v3428_v13  ;;  %v839_v49 = vadd.f32 %v3434_v17, %v730_v44  ;;  %v786_v44 = vadd.f32 %v3437_v19, %v3428_v13  ;;  %v2561_v45 = vpop.f32.mrf.mxu1 }
  0xf3   : > { %v732_v50 = vpop.f32.mrf.mxu0  ;;  %v2821_v53 = vpop.eup %2820 }
  0xf4   : > { %v842_v52 = vadd.f32 %v3434_v17, %v741_v48  ;;  %v733_v54 = vadd.f32 %v732_v50, %v3428_v13  ;;  %2834 = vtanh.f32 %v839_v49  ;;  %v794_v48 = vadd.f32 %v3465_v57, %v3428_v13 }
  0xf5   : > { %v2544_v55 = vpop.f32.mrf.mxu0  ;;  %v2823_v56 = vpop.eup %2822  ;;  %v854_v50 = vadd.f32 %v3434_v17, %v789_v42 }
  0xf6   : > { %v2825_v59 = vpop.eup %2824  ;;  %v840_v60 = vadd.f32 %v3434_v17, %v733_v54  ;;  %v895_v62 = vpack.c.bf16 %v2823_v56, %v2819_v51  ;;  %2836 = vtanh.f32 %v842_v52  ;;  %v754_v5 = vadd.f32 %v2544_v55, %v3428_v13  ;;  %v812_v54 = vpop.f32.mrf.mxu1 }
  0xf7   : > { %v745_v61 = vpop.f32.mrf.mxu0  ;;  %v896_v0 = vpack.c.bf16 %v2821_v53, %v2825_v59  ;;  %v856_v51 = vadd.f32 %v3434_v17, %v797_v27  ;;  %v853_v53 = vadd.f32 %v3434_v17, %v786_v44  ;;  %v855_v19 = vadd.f32 %v3434_v17, %v794_v48 }
  0xf8   : > { %v746_v63 = vadd.f32 %v745_v61, %v3428_v13  ;;  %2838 = vtanh.f32 %v840_v60  ;;  %2578 = vmatprep.mubr.bf16.mxu0 %v895_v62  ;;  %v845_v22 = vadd.f32 %v3434_v17, %v754_v5  ;;  %v805_v59 = vadd.f32 %v3472_v3, %v3428_v13 }
  0xf9   : > { %v2545_v2 = vpop.f32.mrf.mxu0  ;;  %2840 = vtanh.f32 %v841_v58  ;;  %2579 = vmatmul.mubr.bf16.vlgmr.msra.gmra.mxu0 %v896_v0  ;;  %v2827_v14 = vpop.eup %2826  ;;  %v813_v60 = vadd.f32 %v812_v54, %v3428_v13  ;;  %v802_v62 = vadd.f32 %v3458_v46, %v3428_v13  ;;  %v821_v46 = vadd.f32 %v2561_v45, %v3428_v13 }
  0xfa   : > { %v843_v7 = vadd.f32 %v3434_v17, %v746_v63  ;;  %v757_v8 = vadd.f32 %v2545_v2, %v3428_v13  ;;  %v810_v63 = vadd.f32 %v809_v39, %v3428_v13  ;;  %v858_v0 = vadd.f32 %v3434_v17, %v805_v59  ;;  %v2803_v39 = vld [vmem:[%s3795_s9 + $0x30] sm:$0xff]  }
  0xfb   : > { %v748_v11 = vpop.f32.mrf.mxu0  ;;  %v2829_v16 = vpop.eup %2828  ;;  %v860_v2 = vadd.f32 %v3434_v17, %v813_v60  ;;  %v857_v5 = vadd.f32 %v3434_v17, %v802_v62 }
  0xfc   : > { %v846_v12 = vadd.f32 %v3434_v17, %v757_v8  ;;  %v749_v15 = vadd.f32 %v748_v11, %v3428_v13  ;;  %2842 = vtanh.f32 %v843_v7  ;;  %v859_v8 = vadd.f32 %v3434_v17, %v810_v63 }
  0xfd   : > { %v2831_v20 = vpop.eup %2830 }
  0xfe   : > { %v844_v23 = vadd.f32 %v3434_v17, %v749_v15  ;;  %v2833_v24 = vpop.eup %2832  ;;  %2844 = vtanh.f32 %v846_v12  ;;  %v897_v6 = vpack.c.bf16 %v2831_v20, %v2827_v14  ;;  %v818_v12 = vadd.f32 %v3490_v31, %v3428_v13 }
  0xff   : > { %v898_v28 = vpack.c.bf16 %v2829_v16, %v2833_v24  ;;  %v862_v15 = vadd.f32 %v3434_v17, %v821_v46 }
 0x100   : > { %2846 = vtanh.f32 %v844_v23  ;;  %2582 = vmatprep.mubr.bf16.mxu0 %v897_v6  ;;  %v861_v20 = vadd.f32 %v3434_v17, %v818_v12  ;;  %v2796_v17 = vld [vmem:[%s3793_s7 + $0x28] sm:$0xff]  }
 0x101   : > { %2848 = vtanh.f32 %v848_v18  ;;  %2583 = vmatmul.mubr.bf16.gmra.mxu0 %v898_v28  ;;  %v2835_v34 = vpop.eup %2834  ;;  %2614 = vmatprep.subr.bf16.mxu1 %v2796_v17 }
 0x102   : > { %2850 = vtanh.f32 %v845_v22  ;;  %2615 = vmatpush3.bf16.msra.mxu1 %v2796_v17 }
 0x103   : > { %2852 = vtanh.f32 %v847_v25  ;;  %v2837_v35 = vpop.eup %2836 }
 0x104   : > { %2854 = vtanh.f32 %v850_v9  ;;  %v2798_v9 = vld [vmem:[%s3793_s7 + $0x18] sm:$0xff]  }
 0x105   : > { %v2839_v37 = vpop.eup %2838  ;;  %2856 = vtanh.f32 %v852_v36  ;;  %v2800_v36 = vld [vmem:[%s3793_s7 + $0x8] sm:$0xff]  }
 0x106   : > { %v2841_v40 = vpop.eup %2840  ;;  %v899_v41 = vpack.c.bf16 %v2839_v37, %v2835_v34  ;;  %2858 = vtanh.f32 %v849_v38  ;;  %v2797_v34 = vld [vmem:[%s3793_s7 + $0x20] sm:$0xff]   ;;  %v2802_v38 = vld [vmem:[%s3795_s9 + $0x38] sm:$0xff]  }
 0x107   : > { %v900_v43 = vpack.c.bf16 %v2837_v35, %v2841_v40  ;;  %2860 = vtanh.f32 %v851_v4  ;;  %2616 = vmatprep.subr.bf16.mxu1 %v2797_v34  ;;  %v2799_v35 = vld [vmem:[%s3793_s7 + $0x10] sm:$0xff]   ;;  %v2801_v37 = vld [vmem:[%s3793_s7] sm:$0xff]   ;;  %2658 = vmatprep.subr.bf16.mxu0 %v2802_v38  ;;  %v2804_v40 = vld [vmem:[%s3795_s9 + $0x28] sm:$0xff]  }
 0x108   : > { %2586 = vmatprep.mubr.bf16.mxu0 %v899_v41  ;;  %2862 = vtanh.f32 %v854_v50  ;;  %2617 = vmatpush3.bf16.msra.mxu1 %v2797_v34  ;;  %v2805_v4 = vld [vmem:[%s3795_s9 + $0x20] sm:$0xff]   ;;  %v2806_v41 = vld [vmem:[%s3795_s9 + $0x18] sm:$0xff]  }
 0x109   : > { %2587 = vmatmul.mubr.bf16.gmra.mxu0 %v900_v43  ;;  %v2843_v47 = vpop.eup %2842  ;;  %2864 = vtanh.f32 %v856_v51  ;;  %2618 = vmatprep.subr.bf16.mxu1 %v2798_v9  ;;  %v3560_v43 = vld [vmem:[%s3792_s6] ss:$0 sm:$0xff] }
 0x10a   : > { %2866 = vtanh.f32 %v853_v53  ;;  %2659 = vmatpush3.bf16.msra.mxu0 %v2802_v38 }
 0x10b   : > { %v2845_v49 = vpop.eup %2844  ;;  %2868 = vtanh.f32 %v855_v19  ;;  %2660 = vmatprep.subr.bf16.mxu0 %v2803_v39 }
 0x10c   : > { %2870 = vtanh.f32 %v858_v0  ;;  %2619 = vmatpush3.bf16.msra.mxu1 %v2798_v9 }
 0x10d   : > { %v2847_v32 = vpop.eup %2846  ;;  %2872 = vtanh.f32 %v860_v2  ;;  %2620 = vmatprep.subr.bf16.mxu1 %v2799_v35 }
 0x10e   : > { %v2849_v52 = vpop.eup %2848  ;;  %v901_v55 = vpack.c.bf16 %v2847_v32, %v2843_v47  ;;  %2874 = vtanh.f32 %v857_v5  ;;  %2661 = vmatpush3.bf16.msra.mxu0 %v2803_v39 }
 0x10f   : > { %v2851_v56 = vpop.eup %2850  ;;  %2876 = vtanh.f32 %v859_v8  ;;  %2662 = vmatprep.subr.bf16.mxu0 %v2804_v40 }
 0x110   : > { %v2853_v58 = vpop.eup %2852  ;;  %2590 = vmatprep.mubr.bf16.mxu0 %v901_v55  ;;  %v902_v57 = vpack.c.bf16 %v2845_v49, %v2851_v56  ;;  %2878 = vtanh.f32 %v862_v15  ;;  %2621 = vmatpush3.bf16.msra.mxu1 %v2799_v35 }
 0x111   : > { %v903_v61 = vpack.c.bf16 %v2849_v52, %v2853_v58  ;;  %v2855_v1 = vpop.eup %2854  ;;  %2880 = vtanh.f32 %v861_v20  ;;  %2622 = vmatprep.subr.bf16.mxu1 %v2800_v36 }
 0x112   : > { %2591 = vmatmul.mubr.bf16.gmra.mxu0 %v902_v57  ;;  %v2857_v3 = vpop.eup %2856 }
 0x113   : > { %2594 = vmatprep.mubr.bf16.mxu0 %v903_v61  ;;  %v2859_v7 = vpop.eup %2858  ;;  %2663 = vmatpush3.bf16.msra.mxu0 %v2804_v40 }
 0x114   : > { %v2861_v10 = vpop.eup %2860  ;;  %v904_v11 = vpack.c.bf16 %v2855_v1, %v2859_v7  ;;  %2623 = vmatpush3.bf16.msra.mxu1 %v2800_v36  ;;  %2664 = vmatprep.subr.bf16.mxu0 %v2805_v4 }
 0x115   : > { %v905_v14 = vpack.c.bf16 %v2857_v3, %v2861_v10  ;;  %v2863_v16 = vpop.eup %2862  ;;  %2624 = vmatprep.subr.bf16.mxu1 %v2801_v37 }
 0x116   : > { %v2865_v18 = vpop.eup %2864 }
 0x117   : > { %v2867_v21 = vpop.eup %2866  ;;  %2665 = vmatpush3.bf16.msra.mxu0 %v2805_v4 }
 0x118   : > { %v2869_v22 = vpop.eup %2868  ;;  %v906_v23 = vpack.c.bf16 %v2863_v16, %v2867_v21  ;;  %2625 = vmatpush3.bf16.msra.mxu1 %v2801_v37  ;;  %2666 = vmatprep.subr.bf16.mxu0 %v2806_v41 }
 0x119   : > { %v907_v24 = vpack.c.bf16 %v2865_v18, %v2869_v22  ;;  %v2871_v25 = vpop.eup %2870 }
 0x11a   : > { %2595 = vmatmul.mubr.bf16.gmra.mxu0 %v904_v11  ;;  %v2873_v6 = vpop.eup %2872 }
 0x11b   : > { %2598 = vmatprep.mubr.bf16.mxu0 %v905_v14  ;;  %v2875_v13 = vpop.eup %2874  ;;  %2667 = vmatpush3.bf16.msra.mxu0 %v2806_v41 }
 0x11c   : > { %v2877_v26 = vpop.eup %2876  ;;  %v908_v28 = vpack.c.bf16 %v2871_v25, %v2875_v13 }
 0x11d   : > { %v909_v29 = vpack.c.bf16 %v2873_v6, %v2877_v26  ;;  %v2879_v30 = vpop.eup %2878 }
 0x11e   : > { %v2881_v31 = vpop.eup %2880 }
 0x11f   : > { %v910_v33 = vpack.c.bf16 %v2879_v30, %v2881_v31 }
 0x122   : > { %2599 = vmatmul.mubr.bf16.gmra.mxu0 %v906_v23 }
 0x123   : > { %2602 = vmatprep.mubr.bf16.mxu0 %v907_v24 }
 0x12a   : > { %2603 = vmatmul.mubr.bf16.gmra.mxu0 %v908_v28 }
 0x12b   : > { %2606 = vmatprep.mubr.bf16.mxu0 %v909_v29 }
 0x132   : > { %2607 = vmatmul.mubr.bf16.gmra.mxu0 %v910_v33 }
 0x1b9   : > { %v2580_v42 = vpop.f32.mrf.mxu0 }
 0x1ba   : > { %v1025_v48 = vadd.f32 %v2580_v42, %v3560_v43 }
 0x1bb   : > { %v1016_v27 = vpop.f32.mrf.mxu0 }
 0x1bc   : > { %v1017_v44 = vadd.f32 %v3560_v43, %v1016_v27 }
 0x1bd   : > { %v2581_v45 = vpop.f32.mrf.mxu0 }
 0x1be   : > { %v1028_v47 = vadd.f32 %v2581_v45, %v3560_v43  ;;  %2882 = vtanh.f32 %v1017_v44 }
 0x1bf   : > { %v1019_v49 = vpop.f32.mrf.mxu0 }
 0x1c0   : > { %v1020_v50 = vadd.f32 %v3560_v43, %v1019_v49  ;;  %2884 = vtanh.f32 %v1028_v47 }
 0x1c1   : > { %v2584_v32 = vpop.f32.mrf.mxu0 }
 0x1c2   : > { %2886 = vtanh.f32 %v1020_v50  ;;  %v1041_v55 = vadd.f32 %v2584_v32, %v3560_v43 }
 0x1c3   : > { %2888 = vtanh.f32 %v1025_v48  ;;  %v1032_v51 = vpop.f32.mrf.mxu0 }
 0x1c4   : > { %v1033_v52 = vadd.f32 %v3560_v43, %v1032_v51 }
 0x1c5   : > { %v2585_v53 = vpop.f32.mrf.mxu0 }
 0x1c6   : > { %v1044_v54 = vadd.f32 %v2585_v53, %v3560_v43  ;;  %2890 = vtanh.f32 %v1033_v52 }
 0x1c7   : > { %v1035_v56 = vpop.f32.mrf.mxu0 }
 0x1c8   : > { %v1036_v19 = vadd.f32 %v3560_v43, %v1035_v56  ;;  %2892 = vtanh.f32 %v1044_v54 }
 0x1c9   : > { %v2588_v58 = vpop.f32.mrf.mxu0 }
 0x1ca   : > { %2894 = vtanh.f32 %v1036_v19  ;;  %v1057_v1 = vadd.f32 %v2588_v58, %v3560_v43 }
 0x1cb   : > { %2896 = vtanh.f32 %v1041_v55  ;;  %v1048_v59 = vpop.f32.mrf.mxu0  ;;  %v2883_v60 = vpop.eup %2882 }
 0x1cc   : > { %v1049_v57 = vadd.f32 %v3560_v43, %v1048_v59 }
 0x1cd   : > { %v2589_v61 = vpop.f32.mrf.mxu0  ;;  %v2885_v62 = vpop.eup %2884 }
 0x1ce   : > { %v1060_v63 = vadd.f32 %v2589_v61, %v3560_v43  ;;  %2898 = vtanh.f32 %v1049_v57 }
 0x1cf   : > { %v2887_v0 = vpop.eup %2886  ;;  %v1051_v2 = vpop.f32.mrf.mxu0 }
 0x1d0   : > { %v2889_v3 = vpop.eup %2888  ;;  %v1052_v5 = vadd.f32 %v3560_v43, %v1051_v2  ;;  %v1175_v7 = vpack.c.bf16 %v2887_v0, %v2883_v60  ;;  %2900 = vtanh.f32 %v1060_v63 }
 0x1d1   : > { %v1176_v10 = vpack.c.bf16 %v2885_v62, %v2889_v3 }
 0x1d2   : > { %v2592_v8 = vpop.f32.mrf.mxu0  ;;  %2902 = vtanh.f32 %v1052_v5  ;;  %2626 = vmatprep.mubr.bf16.mxu1 %v1175_v7 }
 0x1d3   : > { %2904 = vtanh.f32 %v1057_v1  ;;  %2627 = vmatmul.mubr.bf16.vlgmr.msra.gmra.mxu1 %v1176_v10  ;;  %v2891_v14 = vpop.eup %2890  ;;  %v1073_v20 = vadd.f32 %v2592_v8, %v3560_v43 }
 0x1d4   : > { %v1064_v46 = vpop.f32.mrf.mxu0 }
 0x1d5   : > { %v1065_v11 = vadd.f32 %v3560_v43, %v1064_v46  ;;  %v2893_v15 = vpop.eup %2892 }
 0x1d6   : > { %v2593_v12 = vpop.f32.mrf.mxu0 }
 0x1d7   : > { %v1076_v16 = vadd.f32 %v2593_v12, %v3560_v43  ;;  %v2895_v18 = vpop.eup %2894  ;;  %2906 = vtanh.f32 %v1065_v11 }
 0x1d8   : > { %v1067_v21 = vpop.f32.mrf.mxu0  ;;  %v2897_v22 = vpop.eup %2896  ;;  %v1177_v24 = vpack.c.bf16 %v2895_v18, %v2891_v14 }
 0x1d9   : > { %v1068_v23 = vadd.f32 %v3560_v43, %v1067_v21  ;;  %2908 = vtanh.f32 %v1076_v16  ;;  %v1178_v6 = vpack.c.bf16 %v2893_v15, %v2897_v22 }
 0x1da   : > { %v2596_v25 = vpop.f32.mrf.mxu0  ;;  %2630 = vmatprep.mubr.bf16.mxu1 %v1177_v24 }
 0x1db   : > { %2910 = vtanh.f32 %v1068_v23  ;;  %2631 = vmatmul.mubr.bf16.gmra.mxu1 %v1178_v6  ;;  %v2899_v28 = vpop.eup %2898  ;;  %v1089_v17 = vadd.f32 %v2596_v25, %v3560_v43 }
 0x1dc   : > { %2912 = vtanh.f32 %v1073_v20  ;;  %v1080_v13 = vpop.f32.mrf.mxu0 }
 0x1dd   : > { %v1081_v26 = vadd.f32 %v3560_v43, %v1080_v13  ;;  %v2901_v30 = vpop.eup %2900 }
 0x1de   : > { %v2597_v29 = vpop.f32.mrf.mxu0 }
 0x1df   : > { %v1092_v31 = vadd.f32 %v2597_v29, %v3560_v43  ;;  %v2903_v33 = vpop.eup %2902  ;;  %2914 = vtanh.f32 %v1081_v26  ;;  %v2807_v29 = vld [vmem:[%s3795_s9 + $0x10] sm:$0xff]  }
 0x1e0   : > { %v1083_v34 = vpop.f32.mrf.mxu0  ;;  %v2905_v9 = vpop.eup %2904  ;;  %v1179_v36 = vpack.c.bf16 %v2903_v33, %v2899_v28  ;;  %2668 = vmatprep.subr.bf16.mxu0 %v2807_v29  ;;  %v2810_v33 = vld [vmem:[%s3797_s11 + $0x38] sm:$0xff]  }
 0x1e1   : > { %v1084_v35 = vadd.f32 %v3560_v43, %v1083_v34  ;;  %2916 = vtanh.f32 %v1092_v31  ;;  %v1180_v38 = vpack.c.bf16 %v2901_v30, %v2905_v9  ;;  %2669 = vmatpush3.bf16.msra.mxu0 %v2807_v29  ;;  %v2808_v30 = vld [vmem:[%s3795_s9 + $0x8] sm:$0xff]   ;;  %v2809_v31 = vld [vmem:[%s3795_s9] sm:$0xff]   ;;  %2706 = vmatprep.subr.bf16.mxu1 %v2810_v33 }
 0x1e2   : > { %v2600_v37 = vpop.f32.mrf.mxu0  ;;  %2634 = vmatprep.mubr.bf16.mxu1 %v1179_v36  ;;  %2670 = vmatprep.subr.bf16.mxu0 %v2808_v30  ;;  %v2812_v34 = vld [vmem:[%s3797_s11 + $0x28] sm:$0xff]   ;;  %v2813_v9 = vld [vmem:[%s3797_s11 + $0x20] sm:$0xff]  }
 0x1e3   : > { %2918 = vtanh.f32 %v1084_v35  ;;  %2635 = vmatmul.mubr.bf16.gmra.mxu1 %v1180_v38  ;;  %v1105_v45 = vadd.f32 %v2600_v37, %v3560_v43  ;;  %v2814_v35 = vld [vmem:[%s3797_s11 + $0x18] sm:$0xff]   ;;  %v3621_v37 = vld [vmem:[%s3794_s8] ss:$0 sm:$0xff] }
 0x1e4   : > { %2920 = vtanh.f32 %v1089_v17  ;;  %v1096_v39 = vpop.f32.mrf.mxu0  ;;  %v2907_v4 = vpop.eup %2906  ;;  %v2811_v17 = vld [vmem:[%s3797_s11 + $0x30] sm:$0xff]   ;;  %2707 = vmatpush3.bf16.msra.mxu1 %v2810_v33 }
 0x1e5   : > { %v1097_v40 = vadd.f32 %v3560_v43, %v1096_v39  ;;  %2671 = vmatpush3.bf16.msra.mxu0 %v2808_v30  ;;  %2708 = vmatprep.subr.bf16.mxu1 %v2811_v17 }
 0x1e6   : > { %v2601_v41 = vpop.f32.mrf.mxu0  ;;  %v2909_v42 = vpop.eup %2908  ;;  %2672 = vmatprep.subr.bf16.mxu0 %v2809_v31 }
 0x1e7   : > { %v1108_v27 = vadd.f32 %v2601_v41, %v3560_v43  ;;  %2922 = vtanh.f32 %v1097_v40 }
 0x1e8   : > { %v2911_v44 = vpop.eup %2910  ;;  %v1099_v47 = vpop.f32.mrf.mxu0  ;;  %2709 = vmatpush3.bf16.msra.mxu1 %v2811_v17 }
 0x1e9   : > { %v2913_v48 = vpop.eup %2912  ;;  %v1100_v49 = vadd.f32 %v3560_v43, %v1099_v47  ;;  %v1181_v50 = vpack.c.bf16 %v2911_v44, %v2907_v4  ;;  %2924 = vtanh.f32 %v1108_v27  ;;  %2673 = vmatpush3.bf16.msra.mxu0 %v2809_v31  ;;  %2710 = vmatprep.subr.bf16.mxu1 %v2812_v34 }
 0x1ea   : > { %v2604_v32 = vpop.f32.mrf.mxu0  ;;  %v1182_v51 = vpack.c.bf16 %v2909_v42, %v2913_v48 }
 0x1eb   : > { %2926 = vtanh.f32 %v1100_v49  ;;  %2638 = vmatprep.mubr.bf16.mxu1 %v1181_v50  ;;  %v1121_v59 = vadd.f32 %v2604_v32, %v3560_v43 }
 0x1ec   : > { %2928 = vtanh.f32 %v1105_v45  ;;  %v1112_v52 = vpop.f32.mrf.mxu0  ;;  %2639 = vmatmul.mubr.bf16.gmra.mxu1 %v1182_v51  ;;  %v2915_v54 = vpop.eup %2914 }
 0x1ed   : > { %v1113_v53 = vadd.f32 %v3560_v43, %v1112_v52  ;;  %2711 = vmatpush3.bf16.msra.mxu1 %v2812_v34 }
 0x1ee   : > { %v2605_v55 = vpop.f32.mrf.mxu0  ;;  %v2917_v56 = vpop.eup %2916  ;;  %2712 = vmatprep.subr.bf16.mxu1 %v2813_v9 }
 0x1ef   : > { %v1124_v19 = vadd.f32 %v2605_v55, %v3560_v43  ;;  %2930 = vtanh.f32 %v1113_v53 }
 0x1f0   : > { %v2919_v58 = vpop.eup %2918  ;;  %v1115_v57 = vpop.f32.mrf.mxu0 }
 0x1f1   : > { %v2921_v60 = vpop.eup %2920  ;;  %v1116_v61 = vadd.f32 %v3560_v43, %v1115_v57  ;;  %v1183_v62 = vpack.c.bf16 %v2919_v58, %v2915_v54  ;;  %2932 = vtanh.f32 %v1124_v19  ;;  %2713 = vmatpush3.bf16.msra.mxu1 %v2813_v9 }
 0x1f2   : > { %v2608_v63 = vpop.f32.mrf.mxu0  ;;  %v1184_v0 = vpack.c.bf16 %v2917_v56, %v2921_v60  ;;  %2714 = vmatprep.subr.bf16.mxu1 %v2814_v35 }
 0x1f3   : > { %2934 = vtanh.f32 %v1116_v61  ;;  %2642 = vmatprep.mubr.bf16.mxu1 %v1183_v62  ;;  %v1137_v46 = vadd.f32 %v2608_v63, %v3560_v43 }
 0x1f4   : > { %2936 = vtanh.f32 %v1121_v59  ;;  %v1128_v1 = vpop.f32.mrf.mxu0  ;;  %2643 = vmatmul.mubr.bf16.gmra.mxu1 %v1184_v0  ;;  %v2923_v3 = vpop.eup %2922 }
 0x1f5   : > { %v1129_v2 = vadd.f32 %v3560_v43, %v1128_v1  ;;  %2715 = vmatpush3.bf16.msra.mxu1 %v2814_v35 }
 0x1f6   : > { %v2609_v5 = vpop.f32.mrf.mxu0  ;;  %v2925_v7 = vpop.eup %2924 }
 0x1f7   : > { %v1140_v8 = vadd.f32 %v2609_v5, %v3560_v43  ;;  %2938 = vtanh.f32 %v1129_v2 }
 0x1f8   : > { %v2927_v10 = vpop.eup %2926  ;;  %v1131_v11 = vpop.f32.mrf.mxu0 }
 0x1f9   : > { %v2929_v14 = vpop.eup %2928  ;;  %v1132_v12 = vadd.f32 %v3560_v43, %v1131_v11  ;;  %v1185_v15 = vpack.c.bf16 %v2927_v10, %v2923_v3  ;;  %2940 = vtanh.f32 %v1140_v8 }
 0x1fa   : > { %v1186_v16 = vpack.c.bf16 %v2925_v7, %v2929_v14 }
 0x1fb   : > { %2942 = vtanh.f32 %v1132_v12  ;;  %2646 = vmatprep.mubr.bf16.mxu1 %v1185_v15 }
 0x1fc   : > { %2944 = vtanh.f32 %v1137_v46  ;;  %2647 = vmatmul.mubr.bf16.gmra.mxu1 %v1186_v16  ;;  %v2931_v18 = vpop.eup %2930 }
 0x1fe   : > { %v2933_v20 = vpop.eup %2932 }
 0x200   : > { %v2935_v21 = vpop.eup %2934 }
 0x201   : > { %v2937_v22 = vpop.eup %2936  ;;  %v1187_v23 = vpack.c.bf16 %v2935_v21, %v2931_v18 }
 0x202   : > { %v1188_v24 = vpack.c.bf16 %v2933_v20, %v2937_v22 }
 0x203   : > { %2650 = vmatprep.mubr.bf16.mxu1 %v1187_v23 }
 0x204   : > { %2651 = vmatmul.mubr.bf16.gmra.mxu1 %v1188_v24  ;;  %v2939_v25 = vpop.eup %2938 }
 0x206   : > { %v2941_v6 = vpop.eup %2940 }
 0x208   : > { %v2943_v13 = vpop.eup %2942 }
 0x209   : > { %v2945_v26 = vpop.eup %2944  ;;  %v1189_v43 = vpack.c.bf16 %v2943_v13, %v2939_v25 }
 0x20a   : > { %v1190_v28 = vpack.c.bf16 %v2941_v6, %v2945_v26 }
 0x20b   : > { %2654 = vmatprep.mubr.bf16.mxu1 %v1189_v43 }
 0x20c   : > { %2655 = vmatmul.mubr.bf16.gmra.mxu1 %v1190_v28 }
 0x293   : > { %v2628_v36 = vpop.f32.mrf.mxu1 }
 0x294   : > { %v1305_v41 = vadd.f32 %v2628_v36, %v3621_v37 }
 0x295   : > { %v1296_v38 = vpop.f32.mrf.mxu1 }
 0x296   : > { %v1297_v39 = vadd.f32 %v3621_v37, %v1296_v38 }
 0x297   : > { %v2629_v40 = vpop.f32.mrf.mxu1 }
 0x298   : > { %v1308_v4 = vadd.f32 %v2629_v40, %v3621_v37  ;;  %2946 = vtanh.f32 %v1297_v39 }
 0x299   : > { %v1299_v42 = vpop.f32.mrf.mxu1 }
 0x29a   : > { %v1300_v27 = vadd.f32 %v3621_v37, %v1299_v42  ;;  %2948 = vtanh.f32 %v1308_v4 }
 0x29b   : > { %v2632_v44 = vpop.f32.mrf.mxu1 }
 0x29c   : > { %2950 = vtanh.f32 %v1300_v27  ;;  %v1321_v50 = vadd.f32 %v2632_v44, %v3621_v37 }
 0x29d   : > { %2952 = vtanh.f32 %v1305_v41  ;;  %v1312_v45 = vpop.f32.mrf.mxu1 }
 0x29e   : > { %v1313_v47 = vadd.f32 %v3621_v37, %v1312_v45 }
 0x29f   : > { %v2633_v48 = vpop.f32.mrf.mxu1 }
 0x2a0   : > { %v1324_v49 = vadd.f32 %v2633_v48, %v3621_v37  ;;  %2954 = vtanh.f32 %v1313_v47 }
 0x2a1   : > { %v1315_v32 = vpop.f32.mrf.mxu1 }
 0x2a2   : > { %v1316_v51 = vadd.f32 %v3621_v37, %v1315_v32  ;;  %2956 = vtanh.f32 %v1324_v49 }
 0x2a3   : > { %v2636_v52 = vpop.f32.mrf.mxu1 }
 0x2a4   : > { %2958 = vtanh.f32 %v1316_v51  ;;  %v1337_v57 = vadd.f32 %v2636_v52, %v3621_v37 }
 0x2a5   : > { %2960 = vtanh.f32 %v1321_v50  ;;  %v1328_v53 = vpop.f32.mrf.mxu1  ;;  %v2947_v55 = vpop.eup %2946 }
 0x2a6   : > { %v1329_v54 = vadd.f32 %v3621_v37, %v1328_v53 }
 0x2a7   : > { %v2637_v56 = vpop.f32.mrf.mxu1  ;;  %v2949_v19 = vpop.eup %2948 }
 0x2a8   : > { %v1340_v58 = vadd.f32 %v2637_v56, %v3621_v37  ;;  %2962 = vtanh.f32 %v1329_v54 }
 0x2a9   : > { %v2951_v59 = vpop.eup %2950  ;;  %v1331_v60 = vpop.f32.mrf.mxu1 }
 0x2aa   : > { %v2953_v61 = vpop.eup %2952  ;;  %v1332_v62 = vadd.f32 %v3621_v37, %v1331_v60  ;;  %v1455_v63 = vpack.c.bf16 %v2951_v59, %v2947_v55  ;;  %2964 = vtanh.f32 %v1340_v58 }
 0x2ab   : > { %v1456_v1 = vpack.c.bf16 %v2949_v19, %v2953_v61 }
 0x2ac   : > { %v2640_v0 = vpop.f32.mrf.mxu1  ;;  %2966 = vtanh.f32 %v1332_v62  ;;  %2674 = vmatprep.mubr.bf16.mxu0 %v1455_v63 }
 0x2ad   : > { %2968 = vtanh.f32 %v1337_v57  ;;  %2675 = vmatmul.mubr.bf16.vlgmr.msra.gmra.mxu0 %v1456_v1  ;;  %v2955_v5 = vpop.eup %2954  ;;  %v1353_v11 = vadd.f32 %v2640_v0, %v3621_v37 }
 0x2ae   : > { %v1344_v2 = vpop.f32.mrf.mxu1 }
 0x2af   : > { %v1345_v3 = vadd.f32 %v3621_v37, %v1344_v2  ;;  %v2957_v8 = vpop.eup %2956 }
 0x2b0   : > { %v2641_v7 = vpop.f32.mrf.mxu1 }
 0x2b1   : > { %v1356_v10 = vadd.f32 %v2641_v7, %v3621_v37  ;;  %v2959_v46 = vpop.eup %2958  ;;  %2970 = vtanh.f32 %v1345_v3 }
 0x2b2   : > { %v1347_v14 = vpop.f32.mrf.mxu1  ;;  %v2961_v12 = vpop.eup %2960  ;;  %v1457_v16 = vpack.c.bf16 %v2959_v46, %v2955_v5 }
 0x2b3   : > { %v1348_v15 = vadd.f32 %v3621_v37, %v1347_v14  ;;  %2972 = vtanh.f32 %v1356_v10  ;;  %v1458_v20 = vpack.c.bf16 %v2957_v8, %v2961_v12 }
 0x2b4   : > { %v2644_v18 = vpop.f32.mrf.mxu1  ;;  %2678 = vmatprep.mubr.bf16.mxu0 %v1457_v16 }
 0x2b5   : > { %2974 = vtanh.f32 %v1348_v15  ;;  %2679 = vmatmul.mubr.bf16.gmra.mxu0 %v1458_v20  ;;  %v2963_v23 = vpop.eup %2962  ;;  %v1369_v26 = vadd.f32 %v2644_v18, %v3621_v37 }
 0x2b6   : > { %2976 = vtanh.f32 %v1353_v11  ;;  %v1360_v21 = vpop.f32.mrf.mxu1 }
 0x2b7   : > { %v1361_v22 = vadd.f32 %v3621_v37, %v1360_v21  ;;  %v2965_v25 = vpop.eup %2964 }
 0x2b8   : > { %v2645_v24 = vpop.f32.mrf.mxu1 }
 0x2b9   : > { %v1372_v6 = vadd.f32 %v2645_v24, %v3621_v37  ;;  %v2967_v13 = vpop.eup %2966  ;;  %2978 = vtanh.f32 %v1361_v22  ;;  %v2815_v24 = vld [vmem:[%s3797_s11 + $0x10] sm:$0xff]  }
 0x2ba   : > { %v1363_v43 = vpop.f32.mrf.mxu1  ;;  %v2969_v28 = vpop.eup %2968  ;;  %v1459_v30 = vpack.c.bf16 %v2967_v13, %v2963_v23  ;;  %2716 = vmatprep.subr.bf16.mxu1 %v2815_v24 }
 0x2bb   : > { %v1364_v29 = vadd.f32 %v3621_v37, %v1363_v43  ;;  %2980 = vtanh.f32 %v1372_v6  ;;  %v1460_v33 = vpack.c.bf16 %v2965_v25, %v2969_v28  ;;  %2717 = vmatpush3.bf16.msra.mxu1 %v2815_v24  ;;  %v2816_v25 = vld [vmem:[%s3797_s11 + $0x8] sm:$0xff]   ;;  %v2817_v6 = vld [vmem:[%s3797_s11] sm:$0xff]  }
 0x2bc   : > { %v2648_v31 = vpop.f32.mrf.mxu1  ;;  %2682 = vmatprep.mubr.bf16.mxu0 %v1459_v30  ;;  %2718 = vmatprep.subr.bf16.mxu1 %v2816_v25 }
 0x2bd   : > { %2982 = vtanh.f32 %v1364_v29  ;;  %2683 = vmatmul.mubr.bf16.gmra.mxu0 %v1460_v33  ;;  %v1385_v40 = vadd.f32 %v2648_v31, %v3621_v37 }
 0x2be   : > { %2984 = vtanh.f32 %v1369_v26  ;;  %v1376_v17 = vpop.f32.mrf.mxu1  ;;  %v2971_v9 = vpop.eup %2970  ;;  %v3667_v26 = vld [vmem:[%s3796_s10] ss:$0 sm:$0xff] }
 0x2bf   : > { %v1377_v34 = vadd.f32 %v3621_v37, %v1376_v17  ;;  %2719 = vmatpush3.bf16.msra.mxu1 %v2816_v25 }
 0x2c0   : > { %v2649_v35 = vpop.f32.mrf.mxu1  ;;  %v2973_v36 = vpop.eup %2972  ;;  %2720 = vmatprep.subr.bf16.mxu1 %v2817_v6 }
 0x2c1   : > { %v1388_v38 = vadd.f32 %v2649_v35, %v3621_v37  ;;  %2986 = vtanh.f32 %v1377_v34 }
 0x2c2   : > { %v2975_v39 = vpop.eup %2974  ;;  %v1379_v4 = vpop.f32.mrf.mxu1 }
 0x2c3   : > { %v2977_v41 = vpop.eup %2976  ;;  %v1380_v42 = vadd.f32 %v3621_v37, %v1379_v4  ;;  %v1461_v27 = vpack.c.bf16 %v2975_v39, %v2971_v9  ;;  %2988 = vtanh.f32 %v1388_v38  ;;  %2721 = vmatpush3.bf16.msra.mxu1 %v2817_v6 }
 0x2c4   : > { %v2652_v44 = vpop.f32.mrf.mxu1  ;;  %v1462_v45 = vpack.c.bf16 %v2973_v36, %v2977_v41 }
 0x2c5   : > { %2990 = vtanh.f32 %v1380_v42  ;;  %2686 = vmatprep.mubr.bf16.mxu0 %v1461_v27  ;;  %v1401_v53 = vadd.f32 %v2652_v44, %v3621_v37 }
 0x2c6   : > { %2992 = vtanh.f32 %v1385_v40  ;;  %v1392_v47 = vpop.f32.mrf.mxu1  ;;  %2687 = vmatmul.mubr.bf16.gmra.mxu0 %v1462_v45  ;;  %v2979_v49 = vpop.eup %2978 }
 0x2c7   : > { %v1393_v48 = vadd.f32 %v3621_v37, %v1392_v47 }
 0x2c8   : > { %v2653_v50 = vpop.f32.mrf.mxu1  ;;  %v2981_v32 = vpop.eup %2980 }
 0x2c9   : > { %v1404_v51 = vadd.f32 %v2653_v50, %v3621_v37  ;;  %2994 = vtanh.f32 %v1393_v48 }
 0x2ca   : > { %v2983_v52 = vpop.eup %2982  ;;  %v1395_v54 = vpop.f32.mrf.mxu1 }
 0x2cb   : > { %v2985_v55 = vpop.eup %2984  ;;  %v1396_v56 = vadd.f32 %v3621_v37, %v1395_v54  ;;  %v1463_v19 = vpack.c.bf16 %v2983_v52, %v2979_v49  ;;  %2996 = vtanh.f32 %v1404_v51 }
 0x2cc   : > { %v2656_v58 = vpop.f32.mrf.mxu1  ;;  %v1464_v59 = vpack.c.bf16 %v2981_v32, %v2985_v55 }
 0x2cd   : > { %2998 = vtanh.f32 %v1396_v56  ;;  %2690 = vmatprep.mubr.bf16.mxu0 %v1463_v19  ;;  %v1417_v2 = vadd.f32 %v2656_v58, %v3621_v37 }
 0x2ce   : > { %3000 = vtanh.f32 %v1401_v53  ;;  %v1408_v57 = vpop.f32.mrf.mxu1  ;;  %2691 = vmatmul.mubr.bf16.gmra.mxu0 %v1464_v59  ;;  %v2987_v61 = vpop.eup %2986 }
 0x2cf   : > { %v1409_v60 = vadd.f32 %v3621_v37, %v1408_v57 }
 0x2d0   : > { %v2657_v62 = vpop.f32.mrf.mxu1  ;;  %v2989_v63 = vpop.eup %2988 }
 0x2d1   : > { %v1420_v0 = vadd.f32 %v2657_v62, %v3621_v37  ;;  %3002 = vtanh.f32 %v1409_v60 }
 0x2d2   : > { %v2991_v1 = vpop.eup %2990  ;;  %v1411_v3 = vpop.f32.mrf.mxu1 }
 0x2d3   : > { %v2993_v5 = vpop.eup %2992  ;;  %v1412_v7 = vadd.f32 %v3621_v37, %v1411_v3  ;;  %v1465_v8 = vpack.c.bf16 %v2991_v1, %v2987_v61  ;;  %3004 = vtanh.f32 %v1420_v0 }
 0x2d4   : > { %v1466_v10 = vpack.c.bf16 %v2989_v63, %v2993_v5 }
 0x2d5   : > { %3006 = vtanh.f32 %v1412_v7  ;;  %2694 = vmatprep.mubr.bf16.mxu0 %v1465_v8 }
 0x2d6   : > { %3008 = vtanh.f32 %v1417_v2  ;;  %2695 = vmatmul.mubr.bf16.gmra.mxu0 %v1466_v10  ;;  %v2995_v46 = vpop.eup %2994 }
 0x2d8   : > { %v2997_v11 = vpop.eup %2996 }
 0x2da   : > { %v2999_v14 = vpop.eup %2998 }
 0x2db   : > { %v3001_v12 = vpop.eup %3000  ;;  %v1467_v15 = vpack.c.bf16 %v2999_v14, %v2995_v46 }
 0x2dc   : > { %v1468_v16 = vpack.c.bf16 %v2997_v11, %v3001_v12 }
 0x2dd   : > { %2698 = vmatprep.mubr.bf16.mxu0 %v1467_v15 }
 0x2de   : > { %2699 = vmatmul.mubr.bf16.gmra.mxu0 %v1468_v16  ;;  %v3003_v18 = vpop.eup %3002 }
 0x2e0   : > { %v3005_v20 = vpop.eup %3004 }
 0x2e2   : > { %v3007_v21 = vpop.eup %3006 }
 0x2e3   : > { %v3009_v22 = vpop.eup %3008  ;;  %v1469_v37 = vpack.c.bf16 %v3007_v21, %v3003_v18 }
 0x2e4   : > { %v1470_v23 = vpack.c.bf16 %v3005_v20, %v3009_v22 }
 0x2e5   : > { %2702 = vmatprep.mubr.bf16.mxu0 %v1469_v37 }
 0x2e6   : > { %2703 = vmatmul.mubr.bf16.gmra.mxu0 %v1470_v23 }
 0x36d   : > { %v2676_v13 = vpop.f32.mrf.mxu0 }
 0x36e   : > { %v1585_v31 = vadd.f32 %v2676_v13, %v3667_v26 }
 0x36f   : > { %v1576_v43 = vpop.f32.mrf.mxu0 }
 0x370   : > { %v1577_v28 = vadd.f32 %v3667_v26, %v1576_v43 }
 0x371   : > { %v2677_v29 = vpop.f32.mrf.mxu0 }
 0x372   : > { %v1588_v30 = vadd.f32 %v2677_v29, %v3667_v26  ;;  %3010 = vtanh.f32 %v1577_v28 }
 0x373   : > { %v1579_v33 = vpop.f32.mrf.mxu0 }
 0x374   : > { %v1580_v17 = vadd.f32 %v3667_v26, %v1579_v33  ;;  %3012 = vtanh.f32 %v1588_v30 }
 0x375   : > { %v2680_v34 = vpop.f32.mrf.mxu0 }
 0x376   : > { %3014 = vtanh.f32 %v1580_v17  ;;  %v1601_v39 = vadd.f32 %v2680_v34, %v3667_v26 }
 0x377   : > { %3016 = vtanh.f32 %v1585_v31  ;;  %v1592_v9 = vpop.f32.mrf.mxu0 }
 0x378   : > { %v1593_v35 = vadd.f32 %v3667_v26, %v1592_v9 }
 0x379   : > { %v2681_v36 = vpop.f32.mrf.mxu0 }
 0x37a   : > { %v1604_v38 = vadd.f32 %v2681_v36, %v3667_v26  ;;  %3018 = vtanh.f32 %v1593_v35 }
 0x37b   : > { %v1595_v40 = vpop.f32.mrf.mxu0 }
 0x37c   : > { %v1596_v4 = vadd.f32 %v3667_v26, %v1595_v40  ;;  %3020 = vtanh.f32 %v1604_v38 }
 0x37d   : > { %v2684_v41 = vpop.f32.mrf.mxu0 }
 0x37e   : > { %3022 = vtanh.f32 %v1596_v4  ;;  %v1617_v50 = vadd.f32 %v2684_v41, %v3667_v26 }
 0x37f   : > { %3024 = vtanh.f32 %v1601_v39  ;;  %v1608_v42 = vpop.f32.mrf.mxu0  ;;  %v3011_v44 = vpop.eup %3010 }
 0x380   : > { %v1609_v27 = vadd.f32 %v3667_v26, %v1608_v42 }
 0x381   : > { %v2685_v45 = vpop.f32.mrf.mxu0  ;;  %v3013_v47 = vpop.eup %3012 }
 0x382   : > { %v1620_v48 = vadd.f32 %v2685_v45, %v3667_v26  ;;  %3026 = vtanh.f32 %v1609_v27 }
 0x383   : > { %v3015_v49 = vpop.eup %3014  ;;  %v1611_v32 = vpop.f32.mrf.mxu0 }
 0x384   : > { %v3017_v51 = vpop.eup %3016  ;;  %v1612_v52 = vadd.f32 %v3667_v26, %v1611_v32  ;;  %v1735_v53 = vpack.c.bf16 %v3015_v49, %v3011_v44  ;;  %3028 = vtanh.f32 %v1620_v48 }
 0x385   : > { %v1736_v55 = vpack.c.bf16 %v3013_v47, %v3017_v51 }
 0x386   : > { %v2688_v54 = vpop.f32.mrf.mxu0  ;;  %3030 = vtanh.f32 %v1612_v52  ;;  %2722 = vmatprep.mubr.bf16.mxu1 %v1735_v53 }
 0x387   : > { %3032 = vtanh.f32 %v1617_v50  ;;  %2723 = vmatmul.mubr.bf16.vlgmr.msra.gmra.mxu1 %v1736_v55  ;;  %v3019_v58 = vpop.eup %3018  ;;  %v1633_v62 = vadd.f32 %v2688_v54, %v3667_v26 }
 0x388   : > { %v1624_v56 = vpop.f32.mrf.mxu0 }
 0x389   : > { %v1625_v19 = vadd.f32 %v3667_v26, %v1624_v56  ;;  %v3021_v57 = vpop.eup %3020 }
 0x38a   : > { %v2689_v59 = vpop.f32.mrf.mxu0 }
 0x38b   : > { %v1636_v60 = vadd.f32 %v2689_v59, %v3667_v26  ;;  %v3023_v61 = vpop.eup %3022  ;;  %3034 = vtanh.f32 %v1625_v19 }
 0x38c   : > { %v1627_v63 = vpop.f32.mrf.mxu0  ;;  %v3025_v0 = vpop.eup %3024  ;;  %v1737_v2 = vpack.c.bf16 %v3023_v61, %v3019_v58 }
 0x38d   : > { %v1628_v1 = vadd.f32 %v3667_v26, %v1627_v63  ;;  %3036 = vtanh.f32 %v1636_v60  ;;  %v1738_v5 = vpack.c.bf16 %v3021_v57, %v3025_v0 }
 0x38e   : > { %v2692_v3 = vpop.f32.mrf.mxu0  ;;  %2726 = vmatprep.mubr.bf16.mxu1 %v1737_v2 }
 0x38f   : > { %3038 = vtanh.f32 %v1628_v1  ;;  %2727 = vmatmul.mubr.bf16.gmra.mxu1 %v1738_v5  ;;  %v3027_v10 = vpop.eup %3026  ;;  %v1649_v15 = vadd.f32 %v2692_v3, %v3667_v26 }
 0x390   : > { %3040 = vtanh.f32 %v1633_v62  ;;  %v1640_v7 = vpop.f32.mrf.mxu0 }
 0x391   : > { %v1641_v8 = vadd.f32 %v3667_v26, %v1640_v7  ;;  %v3029_v11 = vpop.eup %3028 }
 0x392   : > { %v2693_v46 = vpop.f32.mrf.mxu0 }
 0x393   : > { %v1652_v14 = vadd.f32 %v2693_v46, %v3667_v26  ;;  %v3031_v12 = vpop.eup %3030  ;;  %3042 = vtanh.f32 %v1641_v8  ;;  %v3704_v46 = vld [vmem:[%s3798_s12] ss:$0 sm:$0xff] }
 0x394   : > { %v1643_v16 = vpop.f32.mrf.mxu0  ;;  %v3033_v18 = vpop.eup %3032  ;;  %v1739_v21 = vpack.c.bf16 %v3031_v12, %v3027_v10 }
 0x395   : > { %v1644_v20 = vadd.f32 %v3667_v26, %v1643_v16  ;;  %3044 = vtanh.f32 %v1652_v14  ;;  %v1740_v37 = vpack.c.bf16 %v3029_v11, %v3033_v18 }
 0x396   : > { %v2696_v22 = vpop.f32.mrf.mxu0  ;;  %2730 = vmatprep.mubr.bf16.mxu1 %v1739_v21 }
 0x397   : > { %3046 = vtanh.f32 %v1644_v20  ;;  %2731 = vmatmul.mubr.bf16.gmra.mxu1 %v1740_v37  ;;  %v1665_v29 = vadd.f32 %v2696_v22, %v3667_v26 }
 0x398   : > { %3048 = vtanh.f32 %v1649_v15  ;;  %v1656_v23 = vpop.f32.mrf.mxu0  ;;  %v3035_v25 = vpop.eup %3034 }
 0x399   : > { %v1657_v24 = vadd.f32 %v3667_v26, %v1656_v23 }
 0x39a   : > { %v2697_v6 = vpop.f32.mrf.mxu0  ;;  %v3037_v13 = vpop.eup %3036 }
 0x39b   : > { %v1668_v43 = vadd.f32 %v2697_v6, %v3667_v26  ;;  %3050 = vtanh.f32 %v1657_v24 }
 0x39c   : > { %v3039_v28 = vpop.eup %3038  ;;  %v1659_v30 = vpop.f32.mrf.mxu0 }
 0x39d   : > { %v3041_v31 = vpop.eup %3040  ;;  %v1660_v33 = vadd.f32 %v3667_v26, %v1659_v30  ;;  %v1741_v17 = vpack.c.bf16 %v3039_v28, %v3035_v25  ;;  %3052 = vtanh.f32 %v1668_v43 }
 0x39e   : > { %v2700_v34 = vpop.f32.mrf.mxu0  ;;  %v1742_v9 = vpack.c.bf16 %v3037_v13, %v3041_v31 }
 0x39f   : > { %3054 = vtanh.f32 %v1660_v33  ;;  %2734 = vmatprep.mubr.bf16.mxu1 %v1741_v17  ;;  %v1681_v42 = vadd.f32 %v2700_v34, %v3667_v26 }
 0x3a0   : > { %3056 = vtanh.f32 %v1665_v29  ;;  %v1672_v35 = vpop.f32.mrf.mxu0  ;;  %2735 = vmatmul.mubr.bf16.gmra.mxu1 %v1742_v9  ;;  %v3043_v38 = vpop.eup %3042 }
 0x3a1   : > { %v1673_v36 = vadd.f32 %v3667_v26, %v1672_v35 }
 0x3a2   : > { %v2701_v39 = vpop.f32.mrf.mxu0  ;;  %v3045_v40 = vpop.eup %3044 }
 0x3a3   : > { %v1684_v4 = vadd.f32 %v2701_v39, %v3667_v26  ;;  %3058 = vtanh.f32 %v1673_v36 }
 0x3a4   : > { %v3047_v41 = vpop.eup %3046  ;;  %v1675_v27 = vpop.f32.mrf.mxu0 }
 0x3a5   : > { %v3049_v44 = vpop.eup %3048  ;;  %v1676_v45 = vadd.f32 %v3667_v26, %v1675_v27  ;;  %v1743_v47 = vpack.c.bf16 %v3047_v41, %v3043_v38  ;;  %3060 = vtanh.f32 %v1684_v4 }
 0x3a6   : > { %v2704_v48 = vpop.f32.mrf.mxu0  ;;  %v1744_v49 = vpack.c.bf16 %v3045_v40, %v3049_v44 }
 0x3a7   : > { %3062 = vtanh.f32 %v1676_v45  ;;  %2738 = vmatprep.mubr.bf16.mxu1 %v1743_v47  ;;  %v1697_v56 = vadd.f32 %v2704_v48, %v3667_v26 }
 0x3a8   : > { %3064 = vtanh.f32 %v1681_v42  ;;  %v1688_v50 = vpop.f32.mrf.mxu0  ;;  %2739 = vmatmul.mubr.bf16.gmra.mxu1 %v1744_v49  ;;  %v3051_v51 = vpop.eup %3050 }
 0x3a9   : > { %v1689_v32 = vadd.f32 %v3667_v26, %v1688_v50 }
 0x3aa   : > { %v2705_v52 = vpop.f32.mrf.mxu0  ;;  %v3053_v53 = vpop.eup %3052 }
 0x3ab   : > { %v1700_v54 = vadd.f32 %v2705_v52, %v3667_v26  ;;  %3066 = vtanh.f32 %v1689_v32 }
 0x3ac   : > { %v3055_v55 = vpop.eup %3054  ;;  %v1691_v19 = vpop.f32.mrf.mxu0 }
 0x3ad   : > { %v3057_v58 = vpop.eup %3056  ;;  %v1692_v59 = vadd.f32 %v3667_v26, %v1691_v19  ;;  %v1745_v57 = vpack.c.bf16 %v3055_v55, %v3051_v51  ;;  %3068 = vtanh.f32 %v1700_v54 }
 0x3ae   : > { %v1746_v60 = vpack.c.bf16 %v3053_v53, %v3057_v58 }
 0x3af   : > { %3070 = vtanh.f32 %v1692_v59  ;;  %2742 = vmatprep.mubr.bf16.mxu1 %v1745_v57 }
 0x3b0   : > { %3072 = vtanh.f32 %v1697_v56  ;;  %2743 = vmatmul.mubr.bf16.gmra.mxu1 %v1746_v60  ;;  %v3059_v61 = vpop.eup %3058 }
 0x3b2   : > { %v3061_v62 = vpop.eup %3060 }
 0x3b4   : > { %v3063_v63 = vpop.eup %3062 }
 0x3b5   : > { %v3065_v0 = vpop.eup %3064  ;;  %v1747_v1 = vpack.c.bf16 %v3063_v63, %v3059_v61 }
 0x3b6   : > { %v1748_v2 = vpack.c.bf16 %v3061_v62, %v3065_v0 }
 0x3b7   : > { %2746 = vmatprep.mubr.bf16.mxu1 %v1747_v1 }
 0x3b8   : > { %2747 = vmatmul.mubr.bf16.gmra.mxu1 %v1748_v2  ;;  %v3067_v3 = vpop.eup %3066 }
 0x3ba   : > { %v3069_v5 = vpop.eup %3068 }
 0x3bc   : > { %v3071_v7 = vpop.eup %3070 }
 0x3bd   : > { %v3073_v8 = vpop.eup %3072  ;;  %v1749_v26 = vpack.c.bf16 %v3071_v7, %v3067_v3 }
 0x3be   : > { %v1750_v10 = vpack.c.bf16 %v3069_v5, %v3073_v8 }
 0x3bf   : > { %2750 = vmatprep.mubr.bf16.mxu1 %v1749_v26 }
 0x3c0   : > { %2751 = vmatmul.mubr.bf16.gmra.mxu1 %v1750_v10 }
 0x447   : > { %v2724_v11 = vpop.f32.mrf.mxu1 }
 0x448   : > { %v1865_v14 = vadd.f32 %v2724_v11, %v3704_v46 }
 0x449   : > { %v1856_v12 = vpop.f32.mrf.mxu1 }
 0x44a   : > { %v2370_v15 = vmul.f32 -1.442695, %v1865_v14  ;;  %v1857_v16 = vadd.f32 %v3704_v46, %v1856_v12 }
 0x44b   : > { %v2725_v18 = vpop.f32.mrf.mxu1 }
 0x44c   : > { %3074 = vpow2.f32 %v2370_v15  ;;  %v2368_v20 = vmul.f32 -1.442695, %v1857_v16  ;;  %v1868_v21 = vadd.f32 %v2725_v18, %v3704_v46 }
 0x44d   : > { %v1859_v22 = vpop.f32.mrf.mxu1 }
 0x44e   : > { %3076 = vpow2.f32 %v2368_v20  ;;  %v2371_v37 = vmul.f32 -1.442695, %v1868_v21  ;;  %v1860_v23 = vadd.f32 %v3704_v46, %v1859_v22 }
 0x44f   : > { %v2728_v24 = vpop.f32.mrf.mxu1 }
 0x450   : > { %3078 = vpow2.f32 %v2371_v37  ;;  %v2369_v25 = vmul.f32 -1.442695, %v1860_v23  ;;  %v1881_v6 = vadd.f32 %v2728_v24, %v3704_v46 }
 0x451   : > { %v1872_v13 = vpop.f32.mrf.mxu1 }
 0x452   : > { %3080 = vpow2.f32 %v2369_v25  ;;  %v2374_v43 = vmul.f32 -1.442695, %v1881_v6  ;;  %v1873_v28 = vadd.f32 %v3704_v46, %v1872_v13 }
 0x453   : > { %v2729_v29 = vpop.f32.mrf.mxu1 }
 0x454   : > { %3082 = vpow2.f32 %v2374_v43  ;;  %v2372_v30 = vmul.f32 -1.442695, %v1873_v28  ;;  %v1884_v31 = vadd.f32 %v2729_v29, %v3704_v46 }
 0x455   : > { %v1875_v33 = vpop.f32.mrf.mxu1 }
 0x456   : > { %3084 = vpow2.f32 %v2372_v30  ;;  %v2375_v17 = vmul.f32 -1.442695, %v1884_v31  ;;  %v1876_v34 = vadd.f32 %v3704_v46, %v1875_v33 }
 0x457   : > { %v2732_v9 = vpop.f32.mrf.mxu1 }
 0x458   : > { %3086 = vpow2.f32 %v2375_v17  ;;  %v2373_v35 = vmul.f32 -1.442695, %v1876_v34  ;;  %v1897_v36 = vadd.f32 %v2732_v9, %v3704_v46 }
 0x459   : > { %v3075_v38 = vpop.eup %3074  ;;  %v1888_v39 = vpop.f32.mrf.mxu1 }
 0x45a   : > { %v2081_v40 = vadd.f32 1.0, %v3075_v38  ;;  %3088 = vpow2.f32 %v2373_v35  ;;  %v2378_v4 = vmul.f32 -1.442695, %v1897_v36  ;;  %v1889_v41 = vadd.f32 %v3704_v46, %v1888_v39 }
 0x45b   : > { %v3077_v42 = vpop.eup %3076  ;;  %v2733_v27 = vpop.f32.mrf.mxu1 }
 0x45c   : > { %3090 = vrcp.f32 %v2081_v40  ;;  %v2079_v44 = vadd.f32 1.0, %v3077_v42  ;;  %v2376_v45 = vmul.f32 -1.442695, %v1889_v41  ;;  %v1900_v47 = vadd.f32 %v2733_v27, %v3704_v46 }
 0x45d   : > { %v3079_v48 = vpop.eup %3078  ;;  %3092 = vpow2.f32 %v2378_v4  ;;  %v1891_v49 = vpop.f32.mrf.mxu1 }
 0x45e   : > { %3094 = vrcp.f32 %v2079_v44  ;;  %v2082_v50 = vadd.f32 1.0, %v3079_v48  ;;  %v2379_v32 = vmul.f32 -1.442695, %v1900_v47  ;;  %v1892_v51 = vadd.f32 %v3704_v46, %v1891_v49 }
 0x45f   : > { %v3081_v52 = vpop.eup %3080  ;;  %3096 = vpow2.f32 %v2376_v45 }
 0x460   : > { %v2736_v53 = vpop.f32.mrf.mxu1  ;;  %3098 = vrcp.f32 %v2082_v50  ;;  %v2080_v54 = vadd.f32 1.0, %v3081_v52  ;;  %v2377_v55 = vmul.f32 -1.442695, %v1892_v51 }
 0x461   : > { %v1913_v56 = vadd.f32 %v2736_v53, %v3704_v46  ;;  %v3083_v19 = vpop.eup %3082  ;;  %3100 = vpow2.f32 %v2379_v32 }
 0x462   : > { %v1904_v58 = vpop.f32.mrf.mxu1  ;;  %3102 = vrcp.f32 %v2080_v54  ;;  %v2085_v59 = vadd.f32 1.0, %v3083_v19 }
 0x463   : > { %v2382_v57 = vmul.f32 -1.442695, %v1913_v56  ;;  %v1905_v60 = vadd.f32 %v3704_v46, %v1904_v58  ;;  %v3085_v61 = vpop.eup %3084  ;;  %3104 = vpow2.f32 %v2377_v55 }
 0x464   : > { %v2737_v62 = vpop.f32.mrf.mxu1  ;;  %3106 = vrcp.f32 %v2085_v59  ;;  %v2083_v63 = vadd.f32 1.0, %v3085_v61 }
 0x465   : > { %v2380_v0 = vmul.f32 -1.442695, %v1905_v60  ;;  %v1916_v1 = vadd.f32 %v2737_v62, %v3704_v46  ;;  %v3087_v2 = vpop.eup %3086  ;;  %3108 = vpow2.f32 %v2382_v57 }
 0x466   : > { %v1907_v3 = vpop.f32.mrf.mxu1  ;;  %3110 = vrcp.f32 %v2083_v63  ;;  %v2086_v5 = vadd.f32 1.0, %v3087_v2 }
 0x467   : > { %v2383_v7 = vmul.f32 -1.442695, %v1916_v1  ;;  %v1908_v8 = vadd.f32 %v3704_v46, %v1907_v3  ;;  %v3089_v26 = vpop.eup %3088  ;;  %3112 = vpow2.f32 %v2380_v0 }
 0x468   : > { %v2740_v10 = vpop.f32.mrf.mxu1  ;;  %3114 = vrcp.f32 %v2086_v5  ;;  %v2084_v11 = vadd.f32 1.0, %v3089_v26 }
 0x469   : > { %v2381_v14 = vmul.f32 -1.442695, %v1908_v8  ;;  %v1929_v12 = vadd.f32 %v2740_v10, %v3704_v46  ;;  %v3091_v15 = vpop.eup %3090  ;;  %3116 = vpow2.f32 %v2383_v7 }
 0x46a   : > { %v1920_v16 = vpop.f32.mrf.mxu1  ;;  %v3093_v18 = vpop.eup %3092  ;;  %2177 = vst [vmem:[%s3727_s16 + $0x10] sm:$0xff] %v3091_v15  ;;  %3118 = vrcp.f32 %v2084_v11 }
 0x46b   : > { %v2386_v20 = vmul.f32 -1.442695, %v1929_v12  ;;  %v1921_v21 = vadd.f32 %v3704_v46, %v1920_v16  ;;  %v3095_v22 = vpop.eup %3094  ;;  %v2089_v37 = vadd.f32 1.0, %v3093_v18  ;;  %3120 = vpow2.f32 %v2381_v14 }
 0x46c   : > { %v2741_v23 = vpop.f32.mrf.mxu1  ;;  %v3097_v24 = vpop.eup %3096  ;;  %2175 = vst [vmem:[%s3727_s16] sm:$0xff] %v3095_v22 }
 0x46d   : > { %3122 = vpow2.f32 %v2386_v20  ;;  %v2384_v25 = vmul.f32 -1.442695, %v1921_v21  ;;  %v1932_v6 = vadd.f32 %v2741_v23, %v3704_v46  ;;  %v3099_v13 = vpop.eup %3098  ;;  %v2087_v43 = vadd.f32 1.0, %v3097_v24 }
 0x46e   : > { %3124 = vrcp.f32 %v2089_v37  ;;  %v1923_v28 = vpop.f32.mrf.mxu1  ;;  %v3101_v29 = vpop.eup %3100  ;;  %2178 = vst [vmem:[%s3727_s16 + $0x18] sm:$0xff] %v3099_v13 }
 0x46f   : > { %3126 = vpow2.f32 %v2384_v25  ;;  %v2387_v30 = vmul.f32 -1.442695, %v1932_v6  ;;  %v1924_v31 = vadd.f32 %v3704_v46, %v1923_v28  ;;  %v3103_v33 = vpop.eup %3102  ;;  %v2090_v17 = vadd.f32 1.0, %v3101_v29 }
 0x470   : > { %3128 = vrcp.f32 %v2087_v43  ;;  %v2744_v34 = vpop.f32.mrf.mxu1  ;;  %v3105_v9 = vpop.eup %3104  ;;  %2176 = vst [vmem:[%s3727_s16 + $0x8] sm:$0xff] %v3103_v33 }
 0x471   : > { %3130 = vpow2.f32 %v2387_v30  ;;  %v2385_v35 = vmul.f32 -1.442695, %v1924_v31  ;;  %v1945_v36 = vadd.f32 %v2744_v34, %v3704_v46  ;;  %v3107_v38 = vpop.eup %3106  ;;  %v2088_v39 = vadd.f32 1.0, %v3105_v9 }
 0x472   : > { %3132 = vrcp.f32 %v2090_v17  ;;  %v1936_v40 = vpop.f32.mrf.mxu1  ;;  %v3109_v4 = vpop.eup %3108  ;;  %2181 = vst [vmem:[%s3727_s16 + $0x30] sm:$0xff] %v3107_v38 }
 0x473   : > { %3134 = vpow2.f32 %v2385_v35  ;;  %v2390_v41 = vmul.f32 -1.442695, %v1945_v36  ;;  %v1937_v42 = vadd.f32 %v3704_v46, %v1936_v40  ;;  %v3111_v27 = vpop.eup %3110  ;;  %v2093_v44 = vadd.f32 1.0, %v3109_v4 }
 0x474   : > { %3136 = vrcp.f32 %v2088_v39  ;;  %v2745_v45 = vpop.f32.mrf.mxu1  ;;  %v3113_v47 = vpop.eup %3112  ;;  %2179 = vst [vmem:[%s3727_s16 + $0x20] sm:$0xff] %v3111_v27 }
 0x475   : > { %3138 = vpow2.f32 %v2390_v41  ;;  %v2388_v48 = vmul.f32 -1.442695, %v1937_v42  ;;  %v1948_v49 = vadd.f32 %v2745_v45, %v3704_v46  ;;  %v3115_v50 = vpop.eup %3114  ;;  %v2091_v32 = vadd.f32 1.0, %v3113_v47 }
 0x476   : > { %3140 = vrcp.f32 %v2093_v44  ;;  %v1939_v51 = vpop.f32.mrf.mxu1  ;;  %v3117_v52 = vpop.eup %3116  ;;  %2182 = vst [vmem:[%s3727_s16 + $0x38] sm:$0xff] %v3115_v50 }
 0x477   : > { %3142 = vpow2.f32 %v2388_v48  ;;  %v2391_v53 = vmul.f32 -1.442695, %v1948_v49  ;;  %v1940_v54 = vadd.f32 %v3704_v46, %v1939_v51  ;;  %v3119_v55 = vpop.eup %3118  ;;  %v2094_v56 = vadd.f32 1.0, %v3117_v52 }
 0x478   : > { %3144 = vrcp.f32 %v2091_v32  ;;  %v2748_v19 = vpop.f32.mrf.mxu1  ;;  %v3121_v58 = vpop.eup %3120  ;;  %2180 = vst [vmem:[%s3727_s16 + $0x28] sm:$0xff] %v3119_v55 }
 0x479   : > { %3146 = vpow2.f32 %v2391_v53  ;;  %v2389_v59 = vmul.f32 -1.442695, %v1940_v54  ;;  %v1961_v57 = vadd.f32 %v2748_v19, %v3704_v46  ;;  %v2092_v61 = vadd.f32 1.0, %v3121_v58 }
 0x47a   : > { %v3123_v60 = vpop.eup %3122  ;;  %3148 = vrcp.f32 %v2094_v56  ;;  %v1952_v62 = vpop.f32.mrf.mxu1 }
 0x47b   : > { %v3125_v63 = vpop.eup %3124  ;;  %v2097_v0 = vadd.f32 1.0, %v3123_v60  ;;  %3150 = vpow2.f32 %v2389_v59  ;;  %v2394_v1 = vmul.f32 -1.442695, %v1961_v57  ;;  %v1953_v2 = vadd.f32 %v3704_v46, %v1952_v62 }
 0x47c   : > { %v3127_v3 = vpop.eup %3126  ;;  %2185 = vst [vmem:[%s3727_s16 + $0x50] sm:$0xff] %v3125_v63  ;;  %3152 = vrcp.f32 %v2092_v61  ;;  %v2749_v5 = vpop.f32.mrf.mxu1 }
 0x47d   : > { %v3129_v7 = vpop.eup %3128  ;;  %3154 = vrcp.f32 %v2097_v0  ;;  %v2095_v8 = vadd.f32 1.0, %v3127_v3  ;;  %v2392_v26 = vmul.f32 -1.442695, %v1953_v2  ;;  %v1964_v10 = vadd.f32 %v2749_v5, %v3704_v46 }
 0x47e   : > { %v3131_v11 = vpop.eup %3130  ;;  %2183 = vst [vmem:[%s3727_s16 + $0x40] sm:$0xff] %v3129_v7  ;;  %3156 = vpow2.f32 %v2394_v1  ;;  %v1955_v14 = vpop.f32.mrf.mxu1 }
 0x47f   : > { %v3133_v12 = vpop.eup %3132  ;;  %3158 = vrcp.f32 %v2095_v8  ;;  %v2098_v15 = vadd.f32 1.0, %v3131_v11  ;;  %v2395_v16 = vmul.f32 -1.442695, %v1964_v10  ;;  %v1956_v18 = vadd.f32 %v3704_v46, %v1955_v14 }
 0x480   : > { %v3135_v20 = vpop.eup %3134  ;;  %2186 = vst [vmem:[%s3727_s16 + $0x58] sm:$0xff] %v3133_v12  ;;  %3160 = vpow2.f32 %v2392_v26  ;;  %v2752_v21 = vpop.f32.mrf.mxu1 }
 0x481   : > { %v3137_v22 = vpop.eup %3136  ;;  %3162 = vrcp.f32 %v2098_v15  ;;  %v2096_v37 = vadd.f32 1.0, %v3135_v20  ;;  %v2393_v23 = vmul.f32 -1.442695, %v1956_v18  ;;  %v1977_v24 = vadd.f32 %v2752_v21, %v3704_v46 }
 0x482   : > { %v3139_v25 = vpop.eup %3138  ;;  %2184 = vst [vmem:[%s3727_s16 + $0x48] sm:$0xff] %v3137_v22  ;;  %3164 = vpow2.f32 %v2395_v16  ;;  %v1968_v6 = vpop.f32.mrf.mxu1 }
 0x483   : > { %v3141_v13 = vpop.eup %3140  ;;  %3166 = vrcp.f32 %v2096_v37  ;;  %v2101_v43 = vadd.f32 1.0, %v3139_v25  ;;  %v2398_v28 = vmul.f32 -1.442695, %v1977_v24  ;;  %v1969_v29 = vadd.f32 %v3704_v46, %v1968_v6 }
 0x484   : > { %v3143_v30 = vpop.eup %3142  ;;  %2189 = vst [vmem:[%s3727_s16 + $0x70] sm:$0xff] %v3141_v13  ;;  %3168 = vpow2.f32 %v2393_v23  ;;  %v2753_v31 = vpop.f32.mrf.mxu1 }
 0x485   : > { %v3145_v33 = vpop.eup %3144  ;;  %3170 = vrcp.f32 %v2101_v43  ;;  %v2099_v17 = vadd.f32 1.0, %v3143_v30  ;;  %v2396_v34 = vmul.f32 -1.442695, %v1969_v29  ;;  %v1980_v9 = vadd.f32 %v2753_v31, %v3704_v46 }
 0x486   : > { %v3147_v35 = vpop.eup %3146  ;;  %2187 = vst [vmem:[%s3727_s16 + $0x60] sm:$0xff] %v3145_v33  ;;  %3172 = vpow2.f32 %v2398_v28  ;;  %v1971_v36 = vpop.f32.mrf.mxu1 }
 0x487   : > { %v3149_v38 = vpop.eup %3148  ;;  %3174 = vrcp.f32 %v2099_v17  ;;  %v2102_v39 = vadd.f32 1.0, %v3147_v35  ;;  %v2399_v40 = vmul.f32 -1.442695, %v1980_v9  ;;  %v1972_v4 = vadd.f32 %v3704_v46, %v1971_v36 }
 0x488   : > { %v3151_v41 = vpop.eup %3150  ;;  %2190 = vst [vmem:[%s3727_s16 + $0x78] sm:$0xff] %v3149_v38  ;;  %3176 = vpow2.f32 %v2396_v34 }
 0x489   : > { %v3153_v42 = vpop.eup %3152  ;;  %3178 = vrcp.f32 %v2102_v39  ;;  %v2100_v27 = vadd.f32 1.0, %v3151_v41  ;;  %v2397_v44 = vmul.f32 -1.442695, %v1972_v4 }
 0x48a   : > { %v3155_v45 = vpop.eup %3154  ;;  %2188 = vst [vmem:[%s3727_s16 + $0x68] sm:$0xff] %v3153_v42  ;;  %3180 = vpow2.f32 %v2399_v40 }
 0x48b   : > { %v3157_v47 = vpop.eup %3156  ;;  %2193 = vst [vmem:[%s3727_s16 + $0x90] sm:$0xff] %v3155_v45  ;;  %3182 = vrcp.f32 %v2100_v27 }
 0x48c   : > { %v3159_v48 = vpop.eup %3158  ;;  %v2105_v49 = vadd.f32 1.0, %v3157_v47  ;;  %3184 = vpow2.f32 %v2397_v44 }
 0x48d   : > { %v3161_v46 = vpop.eup %3160  ;;  %2191 = vst [vmem:[%s3727_s16 + $0x80] sm:$0xff] %v3159_v48 }
 0x48e   : > { %v3163_v50 = vpop.eup %3162  ;;  %3186 = vrcp.f32 %v2105_v49  ;;  %v2103_v32 = vadd.f32 1.0, %v3161_v46 }
 0x48f   : > { %v3165_v51 = vpop.eup %3164  ;;  %2194 = vst [vmem:[%s3727_s16 + $0x98] sm:$0xff] %v3163_v50 }
 0x490   : > { %v3167_v52 = vpop.eup %3166  ;;  %3188 = vrcp.f32 %v2103_v32  ;;  %v2106_v53 = vadd.f32 1.0, %v3165_v51 }
 0x491   : > { %v3169_v54 = vpop.eup %3168  ;;  %2192 = vst [vmem:[%s3727_s16 + $0x88] sm:$0xff] %v3167_v52 }
 0x492   : > { %v3171_v55 = vpop.eup %3170  ;;  %3190 = vrcp.f32 %v2106_v53  ;;  %v2104_v56 = vadd.f32 1.0, %v3169_v54 }
 0x493   : > { %v3173_v19 = vpop.eup %3172  ;;  %2197 = vst [vmem:[%s3727_s16 + $0xb0] sm:$0xff] %v3171_v55 }
 0x494   : > { %v3175_v58 = vpop.eup %3174  ;;  %3192 = vrcp.f32 %v2104_v56  ;;  %v2109_v59 = vadd.f32 1.0, %v3173_v19 }
 0x495   : > { %v3177_v57 = vpop.eup %3176  ;;  %2195 = vst [vmem:[%s3727_s16 + $0xa0] sm:$0xff] %v3175_v58 }
 0x496   : > { %v3179_v60 = vpop.eup %3178  ;;  %3194 = vrcp.f32 %v2109_v59  ;;  %v2107_v61 = vadd.f32 1.0, %v3177_v57 }
 0x497   : > { %v3181_v62 = vpop.eup %3180  ;;  %2198 = vst [vmem:[%s3727_s16 + $0xb8] sm:$0xff] %v3179_v60 }
 0x498   : > { %v3183_v63 = vpop.eup %3182  ;;  %3196 = vrcp.f32 %v2107_v61  ;;  %v2110_v0 = vadd.f32 1.0, %v3181_v62 }
 0x499   : > { %v3185_v1 = vpop.eup %3184  ;;  %2196 = vst [vmem:[%s3727_s16 + $0xa8] sm:$0xff] %v3183_v63 }
 0x49a   : > { %3198 = vrcp.f32 %v2110_v0  ;;  %v2108_v2 = vadd.f32 1.0, %v3185_v1 }
 0x49b   : > { %v3187_v3 = vpop.eup %3186 }
 0x49c   : > { %2201 = vst [vmem:[%s3727_s16 + $0xd0] sm:$0xff] %v3187_v3  ;;  %3200 = vrcp.f32 %v2108_v2 }
 0x49d   : > { %v3189_v5 = vpop.eup %3188 }
 0x49e   : > { %2199 = vst [vmem:[%s3727_s16 + $0xc0] sm:$0xff] %v3189_v5 }
 0x49f   : > { %v3191_v7 = vpop.eup %3190 }
 0x4a0   : > { %2202 = vst [vmem:[%s3727_s16 + $0xd8] sm:$0xff] %v3191_v7 }
 0x4a1   : > { %v3193_v8 = vpop.eup %3192 }
 0x4a2   : > { %2200 = vst [vmem:[%s3727_s16 + $0xc8] sm:$0xff] %v3193_v8 }
 0x4a3   : > { %v3195_v26 = vpop.eup %3194 }
 0x4a4   : > { %2205 = vst [vmem:[%s3727_s16 + $0xf0] sm:$0xff] %v3195_v26 }
 0x4a5   : > { %v3197_v10 = vpop.eup %3196 }
 0x4a6   : > { %2203 = vst [vmem:[%s3727_s16 + $0xe0] sm:$0xff] %v3197_v10 }
 0x4a7   : > { %v3199_v11 = vpop.eup %3198 }
 0x4a8   : > { %2206 = vst [vmem:[%s3727_s16 + $0xf8] sm:$0xff] %v3199_v11 }
 0x4a9   : > { %v3201_v14 = vpop.eup %3200 }
 0x4aa   : > { %2204 = vst [vmem:[%s3727_s16 + $0xe8] sm:$0xff] %v3201_v14 }
 0x4ab PF: > { %s23_s27 = sadd.s32 1, %s3224_s27   ;;  %s3800_s25 = smov %s3220_s26 }
 0x4ac   : > { %p20_p5 = scmp.ge.s32.totalorder %s23_s27, 4   ;;  %s3801_s26 = smov %s3803_s28 }
 0x4ae   :  { %22 = sbr.rel (!%p20_p5) target bundleno = 2 (0x2), region = 105 }

</bundles_post_ra>
